<compile_context>
chip_gen: v7x
topology: tpu7x:2x2x1
jax: 0.10.0
libtpu: 0.0.40
codegen_flags: <defaults>
</compile_context>

<pallas_src>
import functools

import jax
import jax.numpy as jnp
from jax import lax
from jax.experimental import pallas as pl
from jax.experimental.pallas import tpu as pltpu

LN_EPS = 1e-5  # nn.LayerNorm default


def _layernorm(h, gamma, beta):
    # Single-pass LN: sum and sum-of-squares are independent reductions;
    # var = E[x^2] - mean^2 (clamped), f32 throughout.
    inv_n = 1.0 / h.shape[-1]
    mean = jnp.sum(h, axis=-1, keepdims=True) * inv_n
    ex2 = jnp.sum(h * h, axis=-1, keepdims=True) * inv_n
    var = jnp.maximum(ex2 - mean * mean, 0.0)
    return (h - mean) * lax.rsqrt(var + LN_EPS) * gamma + beta


def _gelu_exact(x):
    # PyTorch nn.GELU() default = exact erf formulation (VALU polynomial).
    return 0.5 * x * (1.0 + lax.erf(x * 0.7071067811865476))


def _gelu_tanh(x):
    # tanh approximation (tanh/exp run on the EUP slot); ~1e-3 deviation.
    c = 0.7978845608028654  # sqrt(2/pi)
    return 0.5 * x * (1.0 + jnp.tanh(c * (x + 0.044715 * x * x * x)))


def mlp_kernel(x_ref,
               w1_ref, v1_ref,      # v1 = [bias1; gamma1; beta1]   (3, H)
               w2_ref, v2_ref,      # v2 = [bias2; gamma2; beta2]   (3, H2)
               w3t_ref, b3_ref,     # head: w3^T (1, H2) f32, bias (1, 1) f32
               o_ref,
               *, gelu_approx: bool):
    wdt = w1_ref.dtype               # bf16 by default; f32 MXU accumulation below
    gelu = _gelu_tanh if gelu_approx else _gelu_exact

    x = x_ref[...]
    v1 = v1_ref[...]
    v2 = v2_ref[...]

    # ---- block 1: Linear -> LayerNorm -> GELU  (Dropout(0.3): identity) ----
    h = jnp.dot(x.astype(wdt), w1_ref[...],
                preferred_element_type=jnp.float32) + v1[0:1]
    h = gelu(_layernorm(h, v1[1:2], v1[2:3]))

    # ---- block 2: Linear -> LayerNorm -> GELU  (Dropout(0.2): identity) ----
    h = jnp.dot(h.astype(wdt), w2_ref[...],
                preferred_element_type=jnp.float32) + v2[0:1]
    h = gelu(_layernorm(h, v2[1:2], v2[2:3]))

    # ---- head: Linear(H2 -> 1) as mul + lane reduction, then Sigmoid ----
    y = jnp.sum(h * w3t_ref[...], axis=-1, keepdims=True) + b3_ref[...]
    o_ref[...] = jax.nn.sigmoid(y).astype(o_ref.dtype)


def prepare_params(params, weight_dtype=jnp.bfloat16):
    """One-time packing/casting of the torch-layout parameters.

    Hoisted out of the per-call path: the packed tuple feeds pallas_call
    directly, so no concat/pad/cast XLA ops run on each forward call.
    """
    (w1, b1, g1, be1, w2, b2, g2, be2, w3, b3) = params
    wdt = jnp.dtype(weight_dtype)
    v1 = jnp.concatenate([b1, g1, be1], axis=0).astype(jnp.float32)   # (3, H)
    v2 = jnp.concatenate([b2, g2, be2], axis=0).astype(jnp.float32)   # (3, H2)
    w3t = jnp.transpose(w3).astype(jnp.float32)                       # (Dout, H2)
    return (w1.astype(wdt), v1, w2.astype(wdt), v2, w3t,
            b3.astype(jnp.float32))


def _pick_tile(batch, tile_b):
    """Batch tile: multiple of 8; targets >= 4 grid steps (>= 2 per TC on a
    2-core v7x chip) so the auto double-buffer has an i+1 tile to prefetch."""
    batch = int(batch)
    if batch <= 16:
        return batch                      # single block == full array dims
    tb = max(8, min(int(tile_b), batch))
    tb = (tb // 8) * 8
    target_steps = 4
    if pl.cdiv(batch, tb) < target_steps and batch >= 8 * target_steps:
        tb = ((pl.cdiv(batch, target_steps) + 7) // 8) * 8
    return max(tb, 8)


@functools.partial(jax.jit, static_argnames=("tile_b", "gelu_approx"))
def mlp_forward(x, packed_params, tile_b=256, gelu_approx=False):
    (w1, v1, w2, v2, w3t, b3) = packed_params
    B, Din = x.shape
    H = w1.shape[1]
    H2 = w2.shape[1]
    Dout = w3t.shape[0]
    assert Dout == 1, "MSTD head has output_dim == 1"
    wdt = w1.dtype

    tb = _pick_tile(B, tile_b)
    grid = (pl.cdiv(B, tb),)

    # VMEM budget: weights (pipeline still double-buffers constant-index
    # blocks), double-buffered x/out tiles, f32 activations + bf16 dot copies.
    weight_bytes = (Din * H + H * H2) * wdt.itemsize + H2 * 4
    vec_bytes = (3 * H + 3 * H2 + Dout) * 4
    io_bytes = 2 * tb * (Din + Dout) * 4
    act_bytes = tb * (H + H2) * 6 + tb * Din * wdt.itemsize
    vmem_est = 2 * (weight_bytes + vec_bytes) + io_bytes + act_bytes
    # Clamp: floor at 32 MiB, cap at 48 MiB (headroom under v7x 64 MiB VMEM).
    vmem_limit = int(min(max(vmem_est + (4 << 20), 32 << 20), 48 << 20))

    def const_spec(shape):  # full (un-tiled) resident block, constant index map
        return pl.BlockSpec(shape, lambda i: (0, 0))

    kernel = functools.partial(mlp_kernel, gelu_approx=gelu_approx)

    return pl.pallas_call(
        kernel,
        out_shape=jax.ShapeDtypeStruct((B, Dout), jnp.float32),
        grid_spec=pltpu.PrefetchScalarGridSpec(
            num_scalar_prefetch=0,
            grid=grid,
            in_specs=[
                pl.BlockSpec((tb, Din), lambda i: (i, 0)),
                const_spec((Din, H)), const_spec((3, H)),
                const_spec((H, H2)), const_spec((3, H2)),
                const_spec((Dout, H2)), const_spec((1, Dout)),
            ],
            out_specs=pl.BlockSpec((tb, Dout), lambda i: (i, 0)),
        ),
        compiler_params=pltpu.CompilerParams(
            dimension_semantics=("parallel",),
            vmem_limit_bytes=vmem_limit),
    )(x, w1, v1, w2, v2, w3t, b3)


def init_params(key, input_dim, hidden_dim, output_dim):
    """Deterministic synthetic parameters (same shapes as the torch module)."""
    ks = jax.random.split(key, 6)
    h2 = hidden_dim // 2

    def linear(kw, kb, fan_in, fan_out):
        bound = 1.0 / jnp.sqrt(fan_in)
        w = jax.random.uniform(kw, (fan_in, fan_out), jnp.float32, -bound, bound)
        b = jax.random.uniform(kb, (1, fan_out), jnp.float32, -bound, bound)
        return w, b

    w1, b1 = linear(ks[0], ks[1], input_dim, hidden_dim)
    w2, b2 = linear(ks[2], ks[3], hidden_dim, h2)
    w3, b3 = linear(ks[4], ks[5], h2, output_dim)
    # LayerNorm affine params: gamma=1, beta=0 (torch default init)
    g1 = jnp.ones((1, hidden_dim), jnp.float32)
    be1 = jnp.zeros((1, hidden_dim), jnp.float32)
    g2 = jnp.ones((1, h2), jnp.float32)
    be2 = jnp.zeros((1, h2), jnp.float32)
    return (w1, b1, g1, be1, w2, b2, g2, be2, w3, b3)


def reference_forward_packed(x, packed, gelu_approx=False):
    """Plain-JAX reference on the packed (bf16-weight) operands — same math
    as the kernel, so a tight tolerance applies."""
    (w1, v1, w2, v2, w3t, b3) = packed
    wdt = w1.dtype
    gelu = _gelu_tanh if gelu_approx else _gelu_exact
    h = jnp.dot(x.astype(wdt), w1, preferred_element_type=jnp.float32) + v1[0:1]
    h = gelu(_layernorm(h, v1[1:2], v1[2:3]))
    h = jnp.dot(h.astype(wdt), w2, preferred_element_type=jnp.float32) + v2[0:1]
    h = gelu(_layernorm(h, v2[1:2], v2[2:3]))
    y = jnp.sum(h * w3t, axis=-1, keepdims=True) + b3
    return jax.nn.sigmoid(y)


def reference_forward_f32(x, params):
    """Full-precision reference (eval mode: dropout is identity)."""
    (w1, b1, g1, be1, w2, b2, g2, be2, w3, b3) = params
    h = _gelu_exact(_layernorm(x @ w1 + b1, g1, be1))
    h = _gelu_exact(_layernorm(h @ w2 + b2, g2, be2))
    return jax.nn.sigmoid(h @ w3 + b3)


if __name__ == "__main__":
    # MSTD head dims: input = feature_dim*3 = 768, hidden = 512, output = 1.
    # Small batch for the smoke test; _pick_tile gives tb=16 -> grid=4 here.
    B, INPUT_DIM, HIDDEN_DIM, OUTPUT_DIM = 64, 768, 512, 1

    key = jax.random.PRNGKey(0)
    kx, kp = jax.random.split(key)
    x = jax.random.normal(kx, (B, INPUT_DIM), jnp.float32)
    params = init_params(kp, INPUT_DIM, HIDDEN_DIM, OUTPUT_DIM)
    packed = prepare_params(params)          # one-time pack + bf16 weight cast

    out = jax.block_until_ready(mlp_forward(x, packed))
    assert out.shape == (B, OUTPUT_DIM)

    # Same-math (bf16-weight) reference -> tight tolerance.
    ref = reference_forward_packed(x, packed)
    assert jnp.allclose(out, ref, atol=2e-4, rtol=2e-4), "mismatch vs packed ref"
    # Full-f32 reference -> loose tolerance (bf16 MXU inputs by design).
    ref32 = reference_forward_f32(x, params)
    assert jnp.allclose(out, ref32, atol=2e-2, rtol=2e-2), "mismatch vs f32 ref"

    # TODO(synk): train-mode dropout (stochastic masking) not implemented;
    # forward matches eval()/inference semantics.
    # TODO(synk): for serving-style repeated small-batch calls, keep weights
    # resident across calls via a cross-pallas_call prefetch (P10 pattern).
    print("KERNEL_OK")
</pallas_src>

<mosaic_0001>
module attributes {stable_mosaic.version = 11 : i64} {
  func.func @mlp_kernel(%arg0: i32, %arg1: memref<16x768xf32, #tpu.memory_space<vmem>>, %arg2: memref<768x512xbf16, #tpu.memory_space<vmem>>, %arg3: memref<3x512xf32, #tpu.memory_space<vmem>>, %arg4: memref<512x256xbf16, #tpu.memory_space<vmem>>, %arg5: memref<3x256xf32, #tpu.memory_space<vmem>>, %arg6: memref<1x256xf32, #tpu.memory_space<vmem>>, %arg7: memref<1x1xf32, #tpu.memory_space<vmem>>, %arg8: memref<16x1xf32, #tpu.memory_space<vmem>>) attributes {dimension_semantics = [#tpu.dimension_semantics<parallel>], iteration_bounds = array<i64: 4>, scalar_prefetch = 0 : i64, scratch_operands = 0 : i64, tpu.core_type = #tpu.core_type<tc>, window_params = [{transform_indices = @transform_0, window_bounds = array<i64: 16, 768>}, {pipeline_mode = #tpu.pipeline_mode<synchronous>, transform_indices = @transform_1, window_bounds = array<i64: 768, 512>}, {pipeline_mode = #tpu.pipeline_mode<synchronous>, transform_indices = @transform_2, window_bounds = array<i64: 3, 512>}, {pipeline_mode = #tpu.pipeline_mode<synchronous>, transform_indices = @transform_3, window_bounds = array<i64: 512, 256>}, {pipeline_mode = #tpu.pipeline_mode<synchronous>, transform_indices = @transform_4, window_bounds = array<i64: 3, 256>}, {pipeline_mode = #tpu.pipeline_mode<synchronous>, transform_indices = @transform_5, window_bounds = array<i64: 1, 256>}, {pipeline_mode = #tpu.pipeline_mode<synchronous>, transform_indices = @transform_6, window_bounds = array<i64: 1, 1>}, {transform_indices = @transform_7, window_bounds = array<i64: 16, 1>}]} {
    %c0 = arith.constant 0 : index
    %c0_0 = arith.constant 0 : index
    %0 = vector.load %arg1[%c0, %c0_0] : memref<16x768xf32, #tpu.memory_space<vmem>>, vector<16x768xf32>
    %c0_1 = arith.constant 0 : index
    %c0_2 = arith.constant 0 : index
    %1 = vector.load %arg3[%c0_1, %c0_2] : memref<3x512xf32, #tpu.memory_space<vmem>>, vector<3x512xf32>
    %c0_3 = arith.constant 0 : index
    %c0_4 = arith.constant 0 : index
    %2 = vector.load %arg5[%c0_3, %c0_4] : memref<3x256xf32, #tpu.memory_space<vmem>>, vector<3x256xf32>
    %3 = arith.truncf %0 : vector<16x768xf32> to vector<16x768xbf16>
    %c0_5 = arith.constant 0 : index
    %c0_6 = arith.constant 0 : index
    %4 = vector.load %arg2[%c0_5, %c0_6] : memref<768x512xbf16, #tpu.memory_space<vmem>>, vector<768x512xbf16>
    %cst = arith.constant dense<0.000000e+00> : vector<16x512xf32>
    %5 = tpu.matmul %3, %4, %cst {dimension_numbers = #tpu.dot_dimension_numbers<[1], [0], [0], [1], [0, 0, 1, 1], [], []>} : vector<16x768xbf16>, vector<768x512xbf16>, vector<16x512xf32> -> vector<16x512xf32>
    %6 = vector.extract_strided_slice %1 {offsets = [0, 0], sizes = [1, 512], strides = [1, 1]} : vector<3x512xf32> to vector<1x512xf32>
    %7 = vector.broadcast %6 : vector<1x512xf32> to vector<16x512xf32>
    %8 = arith.addf %5, %7 : vector<16x512xf32>
    %9 = vector.extract_strided_slice %1 {offsets = [1, 0], sizes = [1, 512], strides = [1, 1]} : vector<3x512xf32> to vector<1x512xf32>
    %10 = vector.extract_strided_slice %1 {offsets = [2, 0], sizes = [1, 512], strides = [1, 1]} : vector<3x512xf32> to vector<1x512xf32>
    %cst_7 = arith.constant dense<0.000000e+00> : vector<16xf32>
    %11 = vector.multi_reduction <add>, %8, %cst_7 [1] : vector<16x512xf32> to vector<16xf32>
    %12 = vector.shape_cast %11 : vector<16xf32> to vector<16x1xf32>
    %cst_8 = arith.constant 0.001953125 : f32
    %13 = vector.broadcast %cst_8 : f32 to vector<16x1xf32>
    %14 = arith.mulf %12, %13 : vector<16x1xf32>
    %15 = arith.mulf %8, %8 : vector<16x512xf32>
    %cst_9 = arith.constant dense<0.000000e+00> : vector<16xf32>
    %16 = vector.multi_reduction <add>, %15, %cst_9 [1] : vector<16x512xf32> to vector<16xf32>
    %17 = vector.shape_cast %16 : vector<16xf32> to vector<16x1xf32>
    %cst_10 = arith.constant 0.001953125 : f32
    %18 = vector.broadcast %cst_10 : f32 to vector<16x1xf32>
    %19 = arith.mulf %17, %18 : vector<16x1xf32>
    %20 = arith.mulf %14, %14 : vector<16x1xf32>
    %21 = arith.subf %19, %20 : vector<16x1xf32>
    %cst_11 = arith.constant 0.000000e+00 : f32
    %22 = vector.broadcast %cst_11 : f32 to vector<16x1xf32>
    %23 = arith.maximumf %21, %22 : vector<16x1xf32>
    %24 = vector.broadcast %14 : vector<16x1xf32> to vector<16x512xf32>
    %25 = arith.subf %8, %24 : vector<16x512xf32>
    %cst_12 = arith.constant 9.99999974E-6 : f32
    %26 = vector.broadcast %cst_12 : f32 to vector<16x1xf32>
    %27 = arith.addf %23, %26 : vector<16x1xf32>
    %28 = math.rsqrt %27 : vector<16x1xf32>
    %29 = vector.broadcast %28 : vector<16x1xf32> to vector<16x512xf32>
    %30 = arith.mulf %25, %29 : vector<16x512xf32>
    %31 = vector.broadcast %9 : vector<1x512xf32> to vector<16x512xf32>
    %32 = arith.mulf %30, %31 : vector<16x512xf32>
    %33 = vector.broadcast %10 : vector<1x512xf32> to vector<16x512xf32>
    %34 = arith.addf %32, %33 : vector<16x512xf32>
    %cst_13 = arith.constant 5.000000e-01 : f32
    %35 = vector.broadcast %cst_13 : f32 to vector<16x512xf32>
    %36 = arith.mulf %35, %34 : vector<16x512xf32>
    %cst_14 = arith.constant 0.707106769 : f32
    %37 = vector.broadcast %cst_14 : f32 to vector<16x512xf32>
    %38 = arith.mulf %34, %37 : vector<16x512xf32>
    %39 = math.erf %38 : vector<16x512xf32>
    %cst_15 = arith.constant 1.000000e+00 : f32
    %40 = vector.broadcast %cst_15 : f32 to vector<16x512xf32>
    %41 = arith.addf %40, %39 : vector<16x512xf32>
    %42 = arith.mulf %36, %41 : vector<16x512xf32>
    %43 = arith.truncf %42 : vector<16x512xf32> to vector<16x512xbf16>
    %c0_16 = arith.constant 0 : index
    %c0_17 = arith.constant 0 : index
    %44 = vector.load %arg4[%c0_16, %c0_17] : memref<512x256xbf16, #tpu.memory_space<vmem>>, vector<512x256xbf16>
    %cst_18 = arith.constant dense<0.000000e+00> : vector<16x256xf32>
    %45 = tpu.matmul %43, %44, %cst_18 {dimension_numbers = #tpu.dot_dimension_numbers<[1], [0], [0], [1], [0, 0, 1, 1], [], []>} : vector<16x512xbf16>, vector<512x256xbf16>, vector<16x256xf32> -> vector<16x256xf32>
    %46 = vector.extract_strided_slice %2 {offsets = [0, 0], sizes = [1, 256], strides = [1, 1]} : vector<3x256xf32> to vector<1x256xf32>
    %47 = vector.broadcast %46 : vector<1x256xf32> to vector<16x256xf32>
    %48 = arith.addf %45, %47 : vector<16x256xf32>
    %49 = vector.extract_strided_slice %2 {offsets = [1, 0], sizes = [1, 256], strides = [1, 1]} : vector<3x256xf32> to vector<1x256xf32>
    %50 = vector.extract_strided_slice %2 {offsets = [2, 0], sizes = [1, 256], strides = [1, 1]} : vector<3x256xf32> to vector<1x256xf32>
    %cst_19 = arith.constant dense<0.000000e+00> : vector<16xf32>
    %51 = vector.multi_reduction <add>, %48, %cst_19 [1] : vector<16x256xf32> to vector<16xf32>
    %52 = vector.shape_cast %51 : vector<16xf32> to vector<16x1xf32>
    %cst_20 = arith.constant 3.906250e-03 : f32
    %53 = vector.broadcast %cst_20 : f32 to vector<16x1xf32>
    %54 = arith.mulf %52, %53 : vector<16x1xf32>
    %55 = arith.mulf %48, %48 : vector<16x256xf32>
    %cst_21 = arith.constant dense<0.000000e+00> : vector<16xf32>
    %56 = vector.multi_reduction <add>, %55, %cst_21 [1] : vector<16x256xf32> to vector<16xf32>
    %57 = vector.shape_cast %56 : vector<16xf32> to vector<16x1xf32>
    %cst_22 = arith.constant 3.906250e-03 : f32
    %58 = vector.broadcast %cst_22 : f32 to vector<16x1xf32>
    %59 = arith.mulf %57, %58 : vector<16x1xf32>
    %60 = arith.mulf %54, %54 : vector<16x1xf32>
    %61 = arith.subf %59, %60 : vector<16x1xf32>
    %cst_23 = arith.constant 0.000000e+00 : f32
    %62 = vector.broadcast %cst_23 : f32 to vector<16x1xf32>
    %63 = arith.maximumf %61, %62 : vector<16x1xf32>
    %64 = vector.broadcast %54 : vector<16x1xf32> to vector<16x256xf32>
    %65 = arith.subf %48, %64 : vector<16x256xf32>
    %cst_24 = arith.constant 9.99999974E-6 : f32
    %66 = vector.broadcast %cst_24 : f32 to vector<16x1xf32>
    %67 = arith.addf %63, %66 : vector<16x1xf32>
    %68 = math.rsqrt %67 : vector<16x1xf32>
    %69 = vector.broadcast %68 : vector<16x1xf32> to vector<16x256xf32>
    %70 = arith.mulf %65, %69 : vector<16x256xf32>
    %71 = vector.broadcast %49 : vector<1x256xf32> to vector<16x256xf32>
    %72 = arith.mulf %70, %71 : vector<16x256xf32>
    %73 = vector.broadcast %50 : vector<1x256xf32> to vector<16x256xf32>
    %74 = arith.addf %72, %73 : vector<16x256xf32>
    %cst_25 = arith.constant 5.000000e-01 : f32
    %75 = vector.broadcast %cst_25 : f32 to vector<16x256xf32>
    %76 = arith.mulf %75, %74 : vector<16x256xf32>
    %cst_26 = arith.constant 0.707106769 : f32
    %77 = vector.broadcast %cst_26 : f32 to vector<16x256xf32>
    %78 = arith.mulf %74, %77 : vector<16x256xf32>
    %79 = math.erf %78 : vector<16x256xf32>
    %cst_27 = arith.constant 1.000000e+00 : f32
    %80 = vector.broadcast %cst_27 : f32 to vector<16x256xf32>
    %81 = arith.addf %80, %79 : vector<16x256xf32>
    %82 = arith.mulf %76, %81 : vector<16x256xf32>
    %c0_28 = arith.constant 0 : index
    %c0_29 = arith.constant 0 : index
    %83 = vector.load %arg6[%c0_28, %c0_29] : memref<1x256xf32, #tpu.memory_space<vmem>>, vector<1x256xf32>
    %84 = vector.broadcast %83 : vector<1x256xf32> to vector<16x256xf32>
    %85 = arith.mulf %82, %84 : vector<16x256xf32>
    %cst_30 = arith.constant dense<0.000000e+00> : vector<16xf32>
    %86 = vector.multi_reduction <add>, %85, %cst_30 [1] : vector<16x256xf32> to vector<16xf32>
    %87 = vector.shape_cast %86 : vector<16xf32> to vector<16x1xf32>
    %c0_31 = arith.constant 0 : index
    %c0_32 = arith.constant 0 : index
    %88 = vector.load %arg7[%c0_31, %c0_32] : memref<1x1xf32, #tpu.memory_space<vmem>>, vector<1x1xf32>
    %89 = vector.broadcast %88 : vector<1x1xf32> to vector<16x1xf32>
    %90 = arith.addf %87, %89 : vector<16x1xf32>
    %91 = arith.negf %90 : vector<16x1xf32>
    %92 = math.exp %91 : vector<16x1xf32>
    %cst_33 = arith.constant 1.000000e+00 : f32
    %93 = vector.broadcast %cst_33 : f32 to vector<16x1xf32>
    %94 = arith.addf %93, %92 : vector<16x1xf32>
    %95 = arith.divf %93, %94 : vector<16x1xf32>
    %c0_34 = arith.constant 0 : index
    %c0_35 = arith.constant 0 : index
    %96 = vector.load %arg8[%c0_34, %c0_35] : memref<16x1xf32, #tpu.memory_space<vmem>>, vector<16x1xf32>
    tpu.vector_store %arg8[%c0_34, %c0_35], %95 {strides = array<i32>} : memref<16x1xf32, #tpu.memory_space<vmem>>, vector<16x1xf32>,
    return
  }
  func.func @transform_0(%arg0: i32) -> (i32, i32) {
    %c0_i32 = arith.constant 0 : i32
    %c0_i32_0 = arith.constant 0 : i32
    return %arg0, %c0_i32 : i32, i32
  }
  func.func @transform_1(%arg0: i32) -> (i32, i32) {
    %c0_i32 = arith.constant 0 : i32
    %c0_i32_0 = arith.constant 0 : i32
    %c0_i32_1 = arith.constant 0 : i32
    return %c0_i32, %c0_i32_0 : i32, i32
  }
  func.func @transform_2(%arg0: i32) -> (i32, i32) {
    %c0_i32 = arith.constant 0 : i32
    %c0_i32_0 = arith.constant 0 : i32
    %c0_i32_1 = arith.constant 0 : i32
    return %c0_i32, %c0_i32_0 : i32, i32
  }
  func.func @transform_3(%arg0: i32) -> (i32, i32) {
    %c0_i32 = arith.constant 0 : i32
    %c0_i32_0 = arith.constant 0 : i32
    %c0_i32_1 = arith.constant 0 : i32
    return %c0_i32, %c0_i32_0 : i32, i32
  }
  func.func @transform_4(%arg0: i32) -> (i32, i32) {
    %c0_i32 = arith.constant 0 : i32
    %c0_i32_0 = arith.constant 0 : i32
    %c0_i32_1 = arith.constant 0 : i32
    return %c0_i32, %c0_i32_0 : i32, i32
  }
  func.func @transform_5(%arg0: i32) -> (i32, i32) {
    %c0_i32 = arith.constant 0 : i32
    %c0_i32_0 = arith.constant 0 : i32
    %c0_i32_1 = arith.constant 0 : i32
    return %c0_i32, %c0_i32_0 : i32, i32
  }
  func.func @transform_6(%arg0: i32) -> (i32, i32) {
    %c0_i32 = arith.constant 0 : i32
    %c0_i32_0 = arith.constant 0 : i32
    %c0_i32_1 = arith.constant 0 : i32
    return %c0_i32, %c0_i32_0 : i32, i32
  }
  func.func @transform_7(%arg0: i32) -> (i32, i32) {
    %c0_i32 = arith.constant 0 : i32
    %c0_i32_0 = arith.constant 0 : i32
    return %arg0, %c0_i32 : i32, i32
  }
}

</mosaic_0001>

<bundles_post_ra>
// kernel: mlp_forward.1
= control target key start
LH: loop header
LB: loop body
LE: loop exit
PB: predicated region body
PF: predicated region fallthrough
CT: control target
= control target key end

     0   :  { %s4143_s0 = inlined_call_operand.hbm [shape: f32[64,768], index: 0, kind: input, shape index: {}]   ;;  %s4144_s1 = inlined_call_operand.hbm [shape: bf16[768,512], index: 1, kind: input, shape index: {}]   ;;  %s4145_s2 = inlined_call_operand.hbm [shape: f32[3,512], index: 2, kind: input, shape index: {}]   ;;  %s4146_s3 = inlined_call_operand.hbm [shape: bf16[512,256], index: 3, kind: input, shape index: {}]   ;;  %s4147_s4 = inlined_call_operand.vmem [shape: f32[3,256], index: 4, kind: input, shape index: {}]   ;;  %s4148_s5 = inlined_call_operand.vmem [shape: f32[1,256], index: 5, kind: input, shape index: {}]   ;;  %s4149_s6 = inlined_call_operand.<no memory space> [shape: f32[1,1], index: 6, kind: input, shape index: {}]   ;;  %s4150_s7 = inlined_call_operand.vmem [shape: f32[64,1], index: 7, kind: output, shape index: {}]  }
   0x1   :  { %v12_v0 = vstv %s4149_s6 }
   0x2   :  { %13 = vst [vmem:[#allocation2] sm:$0x1] %v12_v0 }
   0x3   :  { %14 = vsyncpa [#allocation4], 0 }
   0x4   :  { %16 = vsyncpa [#allocation4 + $0x1], 0 }
   0x5   :  { %17 = vsyncpa [#allocation6], 0 }
   0x6   :  { %18 = vsyncpa [#allocation9], 0  ;;  %s3761_s26 = smov 0   ;;  %s3763_s27 = smov 0  }
   0x7   :  { %s3765_s28 = smov 0   ;;  %s3767_s29 = smov 0  }
   0x8 LB: > { %s2738_s6 = sadd.s32 4294967295, %s3706_s29   ;;  %p44_p0 = scmp.ne.s32.totalorder %s3698_s27, %s3694_s26  ;;  %s3706_s29 = sphi %s3767_s29, %s4167_s29   ;;  %s3702_s28 = sphi %s3765_s28, %s4166_s28   ;;  %s3698_s27 = sphi %s3763_s27, %s4165_s27   ;;  %s3694_s26 = sphi %s3761_s26, %s4164_s26  }
   0x9   : > { %p3783_p1 = scmp.eq.s32.totalorder %s2738_s6, 0  ;;  %p2740_p2 = scmp.ge.s32.totalorder %s3706_s29, 1 }
   0xa   : > { %p207_p3 = scmp.lt.s32.totalorder %s3706_s29, 5  ;;  %s3708_s10 = smov [#allocation5]  }
   0xb   : > { %s4155_s30 = scalar_select %p3783_p1, 1, 0 }
   0xc   : > { %p3791_p4 = por %p3783_p1, %p44_p0  ;;  %p3795_p5 = pnand %p2740_p2, %p207_p3 }
   0xd   : > { %s219_s11 = sshll.u32 %s3708_s10, 4  ;;  %s3709_s13 = smov [#allocation7]   ;;  %s3799_s11 = int_to_ptr.vmem [resolvable:$true] %s219_s11 }
   0xe   : > { %s4156_s8 = scalar_select %p3791_p4, 1, 0 }
   0xf   : > { %s4157_s9 = scalar_select %p3795_p5, 1, 0 }
  0x10   : > { %p3064_p6 = pneg %p3795_p5  ;;  %s233_s14 = sshll.u32 %s3709_s13, 4  ;;  %s3809_s14 = int_to_ptr.vmem [resolvable:$true] %s233_s14 }
  0x11   : > { %s3710_s15 = smov [#allocation8]   ;;  %s3550_s19 = scalar_lea.hbm %s4144_s1, 24576 }
  0x12   : > { %p3805_p7 = pnand %p3064_p6, %p3783_p1  ;;  %s3811_s16 = sshll.u32 %s3710_s15, 4  ;;  %s244_s16 = int_to_ptr.vmem [resolvable:$true] %s3811_s16 }
  0x13   : > { %p3551_p8 = scmp.ne.s32.totalorder %s4144_s1, %s3550_s19  ;;  %p3557_p12 = scmp.lt.u32.totalorder %s3550_s19, %s4144_s1 }
  0x14   : > { %p3821_p9 = pneg %p3805_p7 }
  0x16   : > { %p3553_p10 = pnand %p3821_p9, %p3551_p8 }
  0x18   : > { %p3554_p11 = pneg %p3553_p10 }
  0x1a   : > { %p3559_p13 = pnand %p3557_p12, %p3554_p11 }
  0x1c   : > { %3562 = shalt.err (!%p3559_p13)
}
  0x1d   : > { %s3563_s25 = scalar_lea.vmem %s3799_s11, 24576  ;;  %p3571_p6 = scmp.lt.s32.totalorder %s3799_s11, %s3799_s11 }
  0x1e   : > { %p3564_p0 = scmp.ne.s32.totalorder %s3799_s11, %s3563_s25  ;;  %p3572_p1 = scmp.lt.s32.totalorder %s3563_s25, %s3563_s25 }
  0x20   : > { %p3566_p2 = pnand %p3564_p0, %p3821_p9  ;;  %p3573_p8 = por %p3572_p1, %p3571_p6 }
  0x22   : > { %p3567_p3 = pneg %p3566_p2 }
  0x24   : > { %p3574_p10 = pnand %p3573_p8, %p3567_p3 }
  0x26   : > { %3577 = shalt.err (!%p3574_p10)
}
  0x27   : > { %s3711_s26 = smov 256   ;;  %s3712_s10 = smov 16  }
  0x28   : > { %3067 = dma.hbm_to_vmem [thread:$0]  (!%p3805_p7), %s4144_s1, 24576, %s3799_s11, [#allocation6], %s3711_s26, %s3711_s26, %s3712_s10  }
  0x29   : > { %s3578_s19 = scalar_lea.hbm %s4145_s2, 256 }
  0x2a   : > { %p3579_p1 = scmp.ne.s32.totalorder %s4145_s2, %s3578_s19  ;;  %p3585_p13 = scmp.lt.u32.totalorder %s3578_s19, %s4145_s2 }
  0x2c   : > { %p3581_p11 = pnand %p3579_p1, %p3821_p9 }
  0x2e   : > { %p3582_p12 = pneg %p3581_p11 }
  0x30   : > { %p3587_p0 = pnand %p3585_p13, %p3582_p12 }
  0x32   : > { %3590 = shalt.err (!%p3587_p0)
}
  0x33   : > { %s3591_s11 = scalar_lea.vmem %s3809_s14, 256  ;;  %p3599_p8 = scmp.lt.s32.totalorder %s3809_s14, %s3809_s14 }
  0x34   : > { %p3592_p2 = scmp.ne.s32.totalorder %s3809_s14, %s3591_s11  ;;  %p3600_p10 = scmp.lt.s32.totalorder %s3591_s11, %s3591_s11 }
  0x36   : > { %p3594_p3 = pnand %p3592_p2, %p3821_p9  ;;  %p3601_p1 = por %p3600_p10, %p3599_p8 }
  0x38   : > { %p3595_p6 = pneg %p3594_p3 }
  0x3a   : > { %p3602_p11 = pnand %p3601_p1, %p3595_p6 }
  0x3c   : > { %3605 = shalt.err (!%p3602_p11)
}
  0x3d   : > { %3070 = dma.hbm_to_vmem [thread:$0]  (!%p3805_p7), %s4145_s2, 256, %s3809_s14, [#allocation6]  }
  0x3e   : > { %s3606_s15 = scalar_lea.hbm %s4146_s3, 8192 }
  0x3f   : > { %p3607_p12 = scmp.ne.s32.totalorder %s4146_s3, %s3606_s15  ;;  %p3613_p2 = scmp.lt.u32.totalorder %s3606_s15, %s4146_s3 }
  0x41   : > { %p3609_p13 = pnand %p3607_p12, %p3821_p9 }
  0x43   : > { %p3610_p0 = pneg %p3609_p13 }
  0x45   : > { %p3615_p3 = pnand %p3613_p2, %p3610_p0 }
  0x47   : > { %3618 = shalt.err (!%p3615_p3)
}
  0x48   : > { %s3619_s21 = scalar_lea.vmem %s244_s16, 8192  ;;  %p3627_p1 = scmp.lt.s32.totalorder %s244_s16, %s244_s16 }
  0x49   : > { %p3620_p6 = scmp.ne.s32.totalorder %s244_s16, %s3619_s21  ;;  %p3628_p11 = scmp.lt.s32.totalorder %s3619_s21, %s3619_s21 }
  0x4b   : > { %p3622_p8 = pnand %p3620_p6, %p3821_p9  ;;  %p3629_p4 = por %p3628_p11, %p3627_p1 }
  0x4d   : > { %p3623_p10 = pneg %p3622_p8 }
  0x4f   : > { %p3630_p5 = pnand %p3629_p4, %p3623_p10 }
  0x51   : > { %3633 = shalt.err (!%p3630_p5)
}
  0x52   : > { %s3713_s14 = smov 128   ;;  %s3714_s22 = smov 8  }
  0x53   : > { %3073 = dma.hbm_to_vmem [thread:$0]  (!%p3805_p7), %s4146_s3, 8192, %s244_s16, [#allocation9], %s3713_s14, %s3713_s14, %s3714_s22  }
  0x54   : > { %s3885_s11 = sadd.s32 1, %s3706_s29   ;;  %s31_s26 = sadd.s32 1, %s3702_s28 }
  0x55   : > { %s28_s25 = ssub.s32 %s3706_s29, %s3885_s11  ;;  %p38_p5 = scmp.ne.s32.totalorder %s3702_s28, %s3698_s27 }
  0x56   : > { %p29_p4 = scmp.eq.s32.totalorder %s28_s25, 0  ;;  %p39_p9 = scmp.eq.s32.totalorder %s3706_s29, 0 }
  0x57   : > { %p3081_p12 = scmp.lt.s32.totalorder %s3706_s29, 4  ;;  %s266_s13 = sand.u32 1, %s3702_s28  }
  0x58   : > { %s3895_s10 = scalar_select %p29_p4, %s3702_s28, %s31_s26  }
  0x59   : > { %p40_p13 = por %p39_p9, %p38_p5  ;;  %s3047_s15 = smul.u32 96, %s266_s13 }
  0x5a   : > { %s3048_s17 = smul.u32 1536, %s3706_s29  ;;  %s3910_s14 = scalar_lea.sflag [#allocation4], %s266_s13 }
  0x5b   : > { %p3899_p0 = pnand %p3081_p12, %p40_p13  ;;  %s270_s20 = scalar_lea.vmem [#allocation3], %s3047_s15 }
  0x5c   : > { %s3906_s19 = scalar_lea.hbm %s4143_s0, %s3048_s17  ;;  %s278_s21 = sshll.u32 %s270_s20, 4  ;;  %s3908_s21 = int_to_ptr.vmem [resolvable:$true] %s278_s21 }
  0x5d   : > { %s3634_s22 = scalar_lea.hbm %s3906_s19, 1536  ;;  %p3636_p2 = pneg %p3899_p0 }
  0x5e   : > { %p3635_p7 = scmp.ne.s32.totalorder %s3906_s19, %s3634_s22  ;;  %s3639_s25 = scalar_lea.hbm %s4143_s0, 6144 }
  0x5f   : > { %p3640_p8 = scmp.lt.u32.totalorder %s3906_s19, %s4143_s0  ;;  %p3641_p10 = scmp.lt.u32.totalorder %s3639_s25, %s3634_s22 }
  0x60   : > { %p3637_p3 = pnand %p3636_p2, %p3635_p7  ;;  %p3643_p11 = scmp.lt.u32.totalorder %s3634_s22, %s3906_s19 }
  0x61   : > { %p3642_p1 = por %p3641_p10, %p3640_p8 }
  0x62   : > { %p3638_p6 = pneg %p3637_p3 }
  0x63   : > { %p3644_p4 = por %p3643_p11, %p3642_p1 }
  0x65   : > { %p3645_p5 = pnand %p3644_p4, %p3638_p6 }
  0x67   : > { %3648 = shalt.err (!%p3645_p5)
}
  0x68   : > { %s3649_s13 = scalar_lea.vmem %s3908_s21, 1536  ;;  %s3715_s15 = smov [#allocation3]  }
  0x69   : > { %p3650_p9 = scmp.ne.s32.totalorder %s3908_s21, %s3649_s13  ;;  %s3654_s16 = sshll.u32 %s3715_s15, 4  ;;  %s3655_s16 = int_to_ptr.vmem [resolvable:$false] %s3654_s16 }
  0x6a   : > { %s3656_s18 = scalar_lea.vmem %s3655_s16, 3072  ;;  %p3657_p7 = scmp.lt.s32.totalorder %s3908_s21, %s3655_s16 }
  0x6b   : > { %p3652_p12 = pnand %p3650_p9, %p3636_p2  ;;  %p3658_p3 = scmp.lt.s32.totalorder %s3656_s18, %s3649_s13 }
  0x6d   : > { %p3653_p13 = pneg %p3652_p12  ;;  %p3659_p8 = por %p3658_p3, %p3657_p7 }
  0x6f   : > { %p3660_p10 = pnand %p3659_p8, %p3653_p13 }
  0x71   : > { %3663 = shalt.err (!%p3660_p10)
}
  0x72   : > { %s3716_s20 = smov 768   ;;  %s3717_s22 = smov 48  }
  0x73   : > { %3077 = dma.hbm_to_vmem [thread:$0]  (!%p3899_p0), %s3906_s19, 1536, %s3908_s21, %s3910_s14, %s3716_s20, %s3716_s20, %s3717_s22  }
  0x74   : > { %p4161_p2 = scmp.ne.s32.totalorder %s4157_s9, 0 }
  0x75   : > { %s292_s23 = sand.u32 (!%p4161_p2), 1, %s3698_s27   ;;  %p4162_p6 = scmp.ne.s32.totalorder (!%p4161_p2), %s4156_s8, 0 }
  0x76   : > { %290 = sbr.rel (%p4161_p2) target bundleno = 1446 (0x5a6), region = 48  ;;  %s293_s25 = scalar_lea.sflag (!%p4161_p2), [#allocation4], %s292_s23 }
  0x77   : > { %s3049_s24 = smul.u32 (!%p4161_p2), 96, %s292_s23 }
  0x79   : > { %s3941_s26 = scalar_lea.vmem (!%p4161_p2), [#allocation3], %s3049_s24 }
  0x7d   : > { %3681 = dma.done.wait (%p4162_p6), %s293_s25, 1536  }
  0x7e   : > { %3683 = vsyncadd (%p4162_p6), %s293_s25, 4294965760  ;;  %p4163_p1 = scmp.ne.s32.totalorder %s4155_s30, 0 }
  0x80   : > { %3685 = dma.done.wait (%p4163_p1), [#allocation6], 24832  }
  0x81   : > { %3687 = vsyncadd (%p4163_p1), [#allocation6], 4294942464 }
  0x82   : > { %3689 = dma.done.wait (%p4163_p1), [#allocation9], 8192  }
  0x83   : > { %3691 = vsyncadd (%p4163_p1), [#allocation9], 4294959104  ;;  %v3126_v1 = vld [vmem:[#allocation5 + $0x4] ss:$16 sps:$4 sm:$0xff]   ;;  %v3130_v3 = vld [vmem:[#allocation5] ss:$16 sps:$4 sm:$0xff]  }
  0x84   : > { %v3128_v2 = vld [vmem:[#allocation5 + $0x204] ss:$16 sps:$4 sm:$0xff]   ;;  %1557 = vmatprep.subr.bf16.mxu1 %v3126_v1  ;;  %v3131_v4 = vld [vmem:[#allocation5 + $0x200] ss:$16 sps:$4 sm:$0xff]   ;;  %v347_v47 = vld [vmem:[%s3941_s26 + $0x8] sm:$0xff]  ;;  %s2752_s19 = sshll.u32 %s2738_s6, 1 }
  0x85   : > { %1600 = vmatprep.subr.bf16.mxu0 %v3128_v2  ;;  %v3132_v5 = vld [vmem:[#allocation5 + $0x24] ss:$16 sps:$4 sm:$0xff]   ;;  %1558 = vmatpush1.bf16.msra.mxu1 %v3130_v3  ;;  %v3136_v7 = vld [vmem:[#allocation5 + $0x20] ss:$16 sps:$4 sm:$0xff]   ;;  %v353_v50 = vld [vmem:[%s3941_s26 + $0x38] sm:$0xff]  ;;  %p341_p0 = scmp.lt.s32.totalorder %s2752_s19, 7 }
  0x86   : > { %1601 = vmatpush1.bf16.msra.mxu0 %v3131_v4  ;;  %v3134_v6 = vld [vmem:[#allocation5 + $0x224] ss:$16 sps:$4 sm:$0xff]   ;;  %1559 = vmatprep.subr.bf16.mxu1 %v3132_v5  ;;  %v3137_v8 = vld [vmem:[#allocation5 + $0x220] ss:$16 sps:$4 sm:$0xff]   ;;  %v3957_v51 = vpack.c.bf16 %v353_v50, %v347_v47  ;;  %v349_v52 = vld [vmem:[%s3941_s26 + $0x18] sm:$0xff]  ;;  %vm2639_vm0 = vcmask 7168  }
  0x87   : > { %1602 = vmatprep.subr.bf16.mxu0 %v3134_v6  ;;  %v3138_v9 = vld [vmem:[#allocation5 + $0x44] ss:$16 sps:$4 sm:$0xff]   ;;  %v3142_v11 = vld [vmem:[#allocation5 + $0x40] ss:$16 sps:$4 sm:$0xff]   ;;  %v355_v53 = vld [vmem:[%s3941_s26 + $0x48] sm:$0xff]  ;;  %s4169_s19 = smov (!%p341_p0, %s2752_s19), 7 }
  0x88   : > { %v3140_v10 = vld [vmem:[#allocation5 + $0x244] ss:$16 sps:$4 sm:$0xff]   ;;  %v3143_v12 = vld [vmem:[#allocation5 + $0x240] ss:$16 sps:$4 sm:$0xff]   ;;  %v3961_v56 = vpack.c.bf16 %v355_v53, %v349_v52  ;;  %1589 = vmatprep.mubr.bf16.mxu1 %v3957_v51  ;;  %v3267_v47 = vld [vmem:[#allocation5 + $0xe8] ss:$16 sps:$4 sm:$0xff]  }
  0x89   : > { %1560 = vmatpush1.bf16.msra.mxu1 %v3136_v7  ;;  %v3144_v13 = vld [vmem:[#allocation5 + $0x64] ss:$16 sps:$4 sm:$0xff]   ;;  %v3148_v15 = vld [vmem:[#allocation5 + $0x60] ss:$16 sps:$4 sm:$0xff]   ;;  %v3281_v53 = vld [vmem:[#allocation5 + $0x12c] ss:$16 sps:$4 sm:$0xff]  }
  0x8a   : > { %1603 = vmatpush1.bf16.msra.mxu0 %v3137_v8  ;;  %1561 = vmatprep.subr.bf16.mxu1 %v3138_v9  ;;  %v3146_v14 = vld [vmem:[#allocation5 + $0x264] ss:$16 sps:$4 sm:$0xff]   ;;  %v3149_v16 = vld [vmem:[#allocation5 + $0x260] ss:$16 sps:$4 sm:$0xff]   ;;  %s2753_s21 = sshll.u32 %s4169_s19, 3 }
  0x8b   : > { %1604 = vmatprep.subr.bf16.mxu0 %v3140_v10  ;;  %v3150_v17 = vld [vmem:[#allocation5 + $0x84] ss:$16 sps:$4 sm:$0xff]   ;;  %v3154_v19 = vld [vmem:[#allocation5 + $0x80] ss:$16 sps:$4 sm:$0xff]   ;;  %1632 = vmatprep.mubr.bf16.mxu0 %v3961_v56  ;;  %s344_s13 = scalar_lea.vmem %s4150_s7, %s2753_s21 }
  0x8c   : > { %v3152_v18 = vld [vmem:[#allocation5 + $0x284] ss:$16 sps:$4 sm:$0xff]   ;;  %v3155_v20 = vld [vmem:[#allocation5 + $0x280] ss:$16 sps:$4 sm:$0xff]  }
  0x8d   : > { %1562 = vmatpush1.bf16.msra.mxu1 %v3142_v11  ;;  %v3156_v21 = vld [vmem:[#allocation5 + $0xa4] ss:$16 sps:$4 sm:$0xff]   ;;  %v3160_v23 = vld [vmem:[#allocation5 + $0xa0] ss:$16 sps:$4 sm:$0xff]  }
  0x8e   : > { %1605 = vmatpush1.bf16.msra.mxu0 %v3143_v12  ;;  %1563 = vmatprep.subr.bf16.mxu1 %v3144_v13  ;;  %v3158_v22 = vld [vmem:[#allocation5 + $0x2a4] ss:$16 sps:$4 sm:$0xff]   ;;  %v3161_v24 = vld [vmem:[#allocation5 + $0x2a0] ss:$16 sps:$4 sm:$0xff]   ;;  %v3227_v12 = vld [vmem:[#allocation5 + $0xc] ss:$16 sps:$4 sm:$0xff]  }
  0x8f   : > { %1606 = vmatprep.subr.bf16.mxu0 %v3146_v14  ;;  %v3162_v25 = vld [vmem:[#allocation5 + $0xc4] ss:$16 sps:$4 sm:$0xff]   ;;  %v3166_v27 = vld [vmem:[#allocation5 + $0xc0] ss:$16 sps:$4 sm:$0xff]  }
  0x90   : > { %v3164_v26 = vld [vmem:[#allocation5 + $0x2c4] ss:$16 sps:$4 sm:$0xff]   ;;  %v3167_v28 = vld [vmem:[#allocation5 + $0x2c0] ss:$16 sps:$4 sm:$0xff]  }
  0x91   : > { %1564 = vmatpush1.bf16.msra.mxu1 %v3148_v15  ;;  %v3168_v29 = vld [vmem:[#allocation5 + $0xe4] ss:$16 sps:$4 sm:$0xff]   ;;  %v3172_v31 = vld [vmem:[#allocation5 + $0xe0] ss:$16 sps:$4 sm:$0xff]   ;;  %v3225_v15 = vld [vmem:[#allocation5 + $0x8] ss:$16 sps:$4 sm:$0xff]  }
  0x92   : > { %1607 = vmatpush1.bf16.msra.mxu0 %v3149_v16  ;;  %1565 = vmatprep.subr.bf16.mxu1 %v3150_v17  ;;  %v3170_v30 = vld [vmem:[#allocation5 + $0x2e4] ss:$16 sps:$4 sm:$0xff]   ;;  %v3173_v32 = vld [vmem:[#allocation5 + $0x2e0] ss:$16 sps:$4 sm:$0xff]  }
  0x93   : > { %1608 = vmatprep.subr.bf16.mxu0 %v3152_v18  ;;  %v3174_v33 = vld [vmem:[#allocation5 + $0x104] ss:$16 sps:$4 sm:$0xff]   ;;  %v3178_v35 = vld [vmem:[#allocation5 + $0x100] ss:$16 sps:$4 sm:$0xff]   ;;  %v3233_v18 = vld [vmem:[#allocation5 + $0x2c] ss:$16 sps:$4 sm:$0xff]  }
  0x94   : > { %v3176_v34 = vld [vmem:[#allocation5 + $0x304] ss:$16 sps:$4 sm:$0xff]   ;;  %v3179_v36 = vld [vmem:[#allocation5 + $0x300] ss:$16 sps:$4 sm:$0xff]  }
  0x95   : > { %1566 = vmatpush1.bf16.msra.mxu1 %v3154_v19  ;;  %v3180_v37 = vld [vmem:[#allocation5 + $0x124] ss:$16 sps:$4 sm:$0xff]   ;;  %v3184_v39 = vld [vmem:[#allocation5 + $0x120] ss:$16 sps:$4 sm:$0xff]  }
  0x96   : > { %1609 = vmatpush1.bf16.msra.mxu0 %v3155_v20  ;;  %1567 = vmatprep.subr.bf16.mxu1 %v3156_v21  ;;  %v3182_v38 = vld [vmem:[#allocation5 + $0x324] ss:$16 sps:$4 sm:$0xff]   ;;  %v3185_v40 = vld [vmem:[#allocation5 + $0x320] ss:$16 sps:$4 sm:$0xff]   ;;  %v3231_v20 = vld [vmem:[#allocation5 + $0x28] ss:$16 sps:$4 sm:$0xff]  }
  0x97   : > { %1610 = vmatprep.subr.bf16.mxu0 %v3158_v22  ;;  %v3186_v41 = vld [vmem:[#allocation5 + $0x144] ss:$16 sps:$4 sm:$0xff]   ;;  %v3190_v43 = vld [vmem:[#allocation5 + $0x140] ss:$16 sps:$4 sm:$0xff]   ;;  %v3239_v22 = vld [vmem:[#allocation5 + $0x4c] ss:$16 sps:$4 sm:$0xff]  }
  0x98   : > { %v3188_v42 = vld [vmem:[#allocation5 + $0x344] ss:$16 sps:$4 sm:$0xff]   ;;  %v3191_v44 = vld [vmem:[#allocation5 + $0x340] ss:$16 sps:$4 sm:$0xff]  }
  0x99   : > { %1568 = vmatpush1.bf16.msra.mxu1 %v3160_v23  ;;  %v3192_v45 = vld [vmem:[#allocation5 + $0x164] ss:$16 sps:$4 sm:$0xff]   ;;  %v3196_v48 = vld [vmem:[#allocation5 + $0x160] ss:$16 sps:$4 sm:$0xff]  }
  0x9a   : > { %1611 = vmatpush1.bf16.msra.mxu0 %v3161_v24  ;;  %1569 = vmatprep.subr.bf16.mxu1 %v3162_v25  ;;  %v3194_v46 = vld [vmem:[#allocation5 + $0x364] ss:$16 sps:$4 sm:$0xff]   ;;  %v3197_v49 = vld [vmem:[#allocation5 + $0x360] ss:$16 sps:$4 sm:$0xff]   ;;  %v3237_v24 = vld [vmem:[#allocation5 + $0x48] ss:$16 sps:$4 sm:$0xff]  }
  0x9b   : > { %1612 = vmatprep.subr.bf16.mxu0 %v3164_v26  ;;  %v3198_v54 = vld [vmem:[#allocation5 + $0x184] ss:$16 sps:$4 sm:$0xff]   ;;  %v3202_v57 = vld [vmem:[#allocation5 + $0x180] ss:$16 sps:$4 sm:$0xff]   ;;  %v3245_v26 = vld [vmem:[#allocation5 + $0x6c] ss:$16 sps:$4 sm:$0xff]  }
  0x9c   : > { %v3200_v55 = vld [vmem:[#allocation5 + $0x384] ss:$16 sps:$4 sm:$0xff]   ;;  %v3203_v58 = vld [vmem:[#allocation5 + $0x380] ss:$16 sps:$4 sm:$0xff]  }
  0x9d   : > { %1570 = vmatpush1.bf16.msra.mxu1 %v3166_v27  ;;  %v3204_v59 = vld [vmem:[#allocation5 + $0x1a4] ss:$16 sps:$4 sm:$0xff]   ;;  %v3208_v61 = vld [vmem:[#allocation5 + $0x1a0] ss:$16 sps:$4 sm:$0xff]  }
  0x9e   : > { %1613 = vmatpush1.bf16.msra.mxu0 %v3167_v28  ;;  %1571 = vmatprep.subr.bf16.mxu1 %v3168_v29  ;;  %v3206_v60 = vld [vmem:[#allocation5 + $0x3a4] ss:$16 sps:$4 sm:$0xff]   ;;  %v3209_v62 = vld [vmem:[#allocation5 + $0x3a0] ss:$16 sps:$4 sm:$0xff]   ;;  %v3243_v28 = vld [vmem:[#allocation5 + $0x68] ss:$16 sps:$4 sm:$0xff]  }
  0x9f   : > { %1614 = vmatprep.subr.bf16.mxu0 %v3170_v30  ;;  %v3210_v63 = vld [vmem:[#allocation5 + $0x1c4] ss:$16 sps:$4 sm:$0xff]   ;;  %v3214_v1 = vld [vmem:[#allocation5 + $0x1c0] ss:$16 sps:$4 sm:$0xff]   ;;  %v3251_v30 = vld [vmem:[#allocation5 + $0x8c] ss:$16 sps:$4 sm:$0xff]  }
  0xa0   : > { %v3212_v0 = vld [vmem:[#allocation5 + $0x3c4] ss:$16 sps:$4 sm:$0xff]   ;;  %v3215_v2 = vld [vmem:[#allocation5 + $0x3c0] ss:$16 sps:$4 sm:$0xff]  }
  0xa1   : > { %1572 = vmatpush1.bf16.msra.mxu1 %v3172_v31  ;;  %v3216_v3 = vld [vmem:[#allocation5 + $0x1e4] ss:$16 sps:$4 sm:$0xff]   ;;  %v3220_v5 = vld [vmem:[#allocation5 + $0x1e0] ss:$16 sps:$4 sm:$0xff]  }
  0xa2   : > { %1615 = vmatpush1.bf16.msra.mxu0 %v3173_v32  ;;  %1573 = vmatprep.subr.bf16.mxu1 %v3174_v33  ;;  %v3218_v4 = vld [vmem:[#allocation5 + $0x3e4] ss:$16 sps:$4 sm:$0xff]   ;;  %v3221_v6 = vld [vmem:[#allocation5 + $0x3e0] ss:$16 sps:$4 sm:$0xff]   ;;  %v3249_v32 = vld [vmem:[#allocation5 + $0x88] ss:$16 sps:$4 sm:$0xff]  }
  0xa3   : > { %1616 = vmatprep.subr.bf16.mxu0 %v3176_v34  ;;  %v346_v7 = vld [vmem:[%s3941_s26] sm:$0xff]  ;;  %v352_v8 = vld [vmem:[%s3941_s26 + $0x30] sm:$0xff]  ;;  %v3257_v34 = vld [vmem:[#allocation5 + $0xac] ss:$16 sps:$4 sm:$0xff]  }
  0xa4   : > { %v3224_v9 = vld [vmem:[#allocation5 + $0x404] ss:$16 sps:$4 sm:$0xff]   ;;  %v3969_v13 = vpack.c.bf16 %v352_v8, %v346_v7  ;;  %v3222_v14 = vld [vmem:[#allocation5 + $0x400] ss:$16 sps:$4 sm:$0xff]   ;;  %v3303_v8 = vld [vmem:[#allocation5 + $0x1a8] ss:$16 sps:$4 sm:$0xff]  }
  0xa5   : > { %1574 = vmatpush1.bf16.msra.mxu1 %v3178_v35  ;;  %v348_v10 = vld [vmem:[%s3941_s26 + $0x10] sm:$0xff]  ;;  %v354_v11 = vld [vmem:[%s3941_s26 + $0x40] sm:$0xff] }
  0xa6   : > { %1617 = vmatpush1.bf16.msra.mxu0 %v3179_v36  ;;  %1575 = vmatprep.subr.bf16.mxu1 %v3180_v37  ;;  %v3971_v16 = vpack.c.bf16 %v354_v11, %v348_v10  ;;  %v3230_v17 = vld [vmem:[#allocation5 + $0x424] ss:$16 sps:$4 sm:$0xff]   ;;  %v3228_v19 = vld [vmem:[#allocation5 + $0x420] ss:$16 sps:$4 sm:$0xff]   ;;  %v3255_v36 = vld [vmem:[#allocation5 + $0xa8] ss:$16 sps:$4 sm:$0xff]  }
  0xa7   : > { %1618 = vmatprep.subr.bf16.mxu0 %v3182_v38  ;;  %v3236_v21 = vld [vmem:[#allocation5 + $0x444] ss:$16 sps:$4 sm:$0xff]   ;;  %v3234_v23 = vld [vmem:[#allocation5 + $0x440] ss:$16 sps:$4 sm:$0xff]   ;;  %v3263_v38 = vld [vmem:[#allocation5 + $0xcc] ss:$16 sps:$4 sm:$0xff]  }
  0xa8   : > { %v3242_v25 = vld [vmem:[#allocation5 + $0x464] ss:$16 sps:$4 sm:$0xff]   ;;  %v3240_v27 = vld [vmem:[#allocation5 + $0x460] ss:$16 sps:$4 sm:$0xff]   ;;  %v3311_v10 = vld [vmem:[#allocation5 + $0x1cc] ss:$16 sps:$4 sm:$0xff]  }
  0xa9   : > { %1576 = vmatpush1.bf16.msra.mxu1 %v3184_v39  ;;  %v3248_v29 = vld [vmem:[#allocation5 + $0x484] ss:$16 sps:$4 sm:$0xff]   ;;  %v3246_v31 = vld [vmem:[#allocation5 + $0x480] ss:$16 sps:$4 sm:$0xff]  }
  0xaa   : > { %1619 = vmatpush1.bf16.msra.mxu0 %v3185_v40  ;;  %1577 = vmatprep.subr.bf16.mxu1 %v3186_v41  ;;  %v3254_v33 = vld [vmem:[#allocation5 + $0x4a4] ss:$16 sps:$4 sm:$0xff]   ;;  %v3252_v35 = vld [vmem:[#allocation5 + $0x4a0] ss:$16 sps:$4 sm:$0xff]   ;;  %v3261_v40 = vld [vmem:[#allocation5 + $0xc8] ss:$16 sps:$4 sm:$0xff]  }
  0xab   : > { %1620 = vmatprep.subr.bf16.mxu0 %v3188_v42  ;;  %v3260_v37 = vld [vmem:[#allocation5 + $0x4c4] ss:$16 sps:$4 sm:$0xff]   ;;  %v3258_v39 = vld [vmem:[#allocation5 + $0x4c0] ss:$16 sps:$4 sm:$0xff]   ;;  %v351_v42 = vld [vmem:[%s3941_s26 + $0x28] sm:$0xff] }
  0xac   : > { %v3266_v41 = vld [vmem:[#allocation5 + $0x4e4] ss:$16 sps:$4 sm:$0xff]   ;;  %v3270_v50 = vld [vmem:[#allocation5 + $0x500] ss:$16 sps:$4 sm:$0xff]  }
  0xad   : > { %1578 = vmatpush1.bf16.msra.mxu1 %v3190_v43  ;;  %v357_v43 = vld [vmem:[%s3941_s26 + $0x58] sm:$0xff]  ;;  %v3278_v52 = vld [vmem:[#allocation5 + $0x524] ss:$16 sps:$4 sm:$0xff]   ;;  %v3300_v7 = vld [vmem:[#allocation5 + $0x5a0] ss:$16 sps:$4 sm:$0xff]  }
  0xae   : > { %1621 = vmatpush1.bf16.msra.mxu0 %v3191_v44  ;;  %1579 = vmatprep.subr.bf16.mxu1 %v3192_v45  ;;  %v3269_v44 = vld [vmem:[#allocation5 + $0xec] ss:$16 sps:$4 sm:$0xff]   ;;  %v3978_v45 = vpack.c.bf16 %v357_v43, %v351_v42  ;;  %v3306_v11 = vld [vmem:[#allocation5 + $0x5c0] ss:$16 sps:$4 sm:$0xff]   ;;  %v3351_v43 = vld [vmem:[#allocation5 + $0x368] ss:$16 sps:$4 sm:$0xff]  }
  0xaf   : > { %1622 = vmatprep.subr.bf16.mxu0 %v3194_v46  ;;  %v3264_v46 = vld [vmem:[#allocation5 + $0x4e0] ss:$16 sps:$4 sm:$0xff]   ;;  %v3353_v42 = vld [vmem:[#allocation5 + $0x36c] ss:$16 sps:$4 sm:$0xff]  }
  0xb1   : > { %1580 = vmatpush1.bf16.msra.mxu1 %v3196_v48  ;;  %v3272_v48 = vld [vmem:[#allocation5 + $0x504] ss:$16 sps:$4 sm:$0xff]  }
  0xb2   : > { %1623 = vmatpush1.bf16.msra.mxu0 %v3197_v49  ;;  %1581 = vmatprep.subr.bf16.mxu1 %v3198_v54  ;;  %v3275_v49 = vld [vmem:[#allocation5 + $0x10c] ss:$16 sps:$4 sm:$0xff]   ;;  %v3276_v54 = vld [vmem:[#allocation5 + $0x520] ss:$16 sps:$4 sm:$0xff]  }
  0xb3   : > { %1624 = vmatprep.subr.bf16.mxu0 %v3200_v55  ;;  %v3279_v55 = vld [vmem:[#allocation5 + $0x128] ss:$16 sps:$4 sm:$0xff]  }
  0xb5   : > { %1582 = vmatpush1.bf16.msra.mxu1 %v3202_v57  ;;  %v3284_v57 = vld [vmem:[#allocation5 + $0x544] ss:$16 sps:$4 sm:$0xff]  }
  0xb6   : > { %1625 = vmatpush1.bf16.msra.mxu0 %v3203_v58  ;;  %1583 = vmatprep.subr.bf16.mxu1 %v3204_v59  ;;  %v3287_v58 = vld [vmem:[#allocation5 + $0x14c] ss:$16 sps:$4 sm:$0xff]   ;;  %v3282_v59 = vld [vmem:[#allocation5 + $0x540] ss:$16 sps:$4 sm:$0xff]  }
  0xb7   : > { %1626 = vmatprep.subr.bf16.mxu0 %v3206_v60  ;;  %v3285_v60 = vld [vmem:[#allocation5 + $0x148] ss:$16 sps:$4 sm:$0xff]  }
  0xb9   : > { %1584 = vmatpush1.bf16.msra.mxu1 %v3208_v61  ;;  %v3290_v61 = vld [vmem:[#allocation5 + $0x564] ss:$16 sps:$4 sm:$0xff]  }
  0xba   : > { %1627 = vmatpush1.bf16.msra.mxu0 %v3209_v62  ;;  %1585 = vmatprep.subr.bf16.mxu1 %v3210_v63  ;;  %v3293_v62 = vld [vmem:[#allocation5 + $0x16c] ss:$16 sps:$4 sm:$0xff]   ;;  %v3288_v63 = vld [vmem:[#allocation5 + $0x560] ss:$16 sps:$4 sm:$0xff]  }
  0xbb   : > { %1628 = vmatprep.subr.bf16.mxu0 %v3212_v0  ;;  %v3291_v0 = vld [vmem:[#allocation5 + $0x168] ss:$16 sps:$4 sm:$0xff]  }
  0xbd   : > { %1586 = vmatpush1.bf16.msra.mxu1 %v3214_v1  ;;  %v3296_v1 = vld [vmem:[#allocation5 + $0x584] ss:$16 sps:$4 sm:$0xff]  }
  0xbe   : > { %1629 = vmatpush1.bf16.msra.mxu0 %v3215_v2  ;;  %1587 = vmatprep.subr.bf16.mxu1 %v3216_v3  ;;  %v3299_v2 = vld [vmem:[#allocation5 + $0x18c] ss:$16 sps:$4 sm:$0xff]   ;;  %v3294_v3 = vld [vmem:[#allocation5 + $0x580] ss:$16 sps:$4 sm:$0xff]  }
  0xbf   : > { %1630 = vmatprep.subr.bf16.mxu0 %v3218_v4  ;;  %v3297_v4 = vld [vmem:[#allocation5 + $0x188] ss:$16 sps:$4 sm:$0xff]  }
  0xc1   : > { %1588 = vmatpush1.bf16.msra.mxu1 %v3220_v5  ;;  %v3302_v5 = vld [vmem:[#allocation5 + $0x5a4] ss:$16 sps:$4 sm:$0xff]  }
  0xc2   : > { %1631 = vmatpush1.bf16.msra.mxu0 %v3221_v6  ;;  %1686 = vmatprep.subr.bf16.mxu1 %v3227_v12  ;;  %v3305_v6 = vld [vmem:[#allocation5 + $0x1ac] ss:$16 sps:$4 sm:$0xff]   ;;  %v3309_v12 = vld [vmem:[#allocation5 + $0x1c8] ss:$16 sps:$4 sm:$0xff]  }
  0xc3   : > { %1643 = vmatprep.subr.bf16.mxu0 %v3224_v9  ;;  %v3308_v9 = vld [vmem:[#allocation5 + $0x5c4] ss:$16 sps:$4 sm:$0xff]  }
  0xc4   : > { %1590 = vmatmul.mubr.bf16.vlgmr.msra.gmra.mrb[0].mxu1 %v3969_v13 }
  0xc5   : > { %1633 = vmatmul.mubr.bf16.vlgmr.msra.gmra.mrb[0].mxu0 %v3971_v16  ;;  %1687 = vmatpush1.bf16.msra.mxu1 %v3225_v15  ;;  %v3317_v15 = vld [vmem:[#allocation5 + $0x1ec] ss:$16 sps:$4 sm:$0xff]  }
  0xc6   : > { %1644 = vmatpush1.bf16.msra.mxu0 %v3222_v14  ;;  %1688 = vmatprep.subr.bf16.mxu1 %v3233_v18  ;;  %v3314_v14 = vld [vmem:[#allocation5 + $0x5e4] ss:$16 sps:$4 sm:$0xff]   ;;  %v3315_v18 = vld [vmem:[#allocation5 + $0x1e8] ss:$16 sps:$4 sm:$0xff]  }
  0xc7   : > { %1645 = vmatprep.subr.bf16.mxu0 %v3230_v17  ;;  %1718 = vmatprep.mubr.bf16.mxu1 %v3957_v51  ;;  %v3273_v51 = vld [vmem:[#allocation5 + $0x108] ss:$16 sps:$4 sm:$0xff]   ;;  %v3312_v17 = vld [vmem:[#allocation5 + $0x5e0] ss:$16 sps:$4 sm:$0xff]  }
  0xc8   : > { %1675 = vmatprep.mubr.bf16.mxu0 %v3978_v45 }
  0xc9   : > { %1689 = vmatpush1.bf16.msra.mxu1 %v3231_v20  ;;  %v356_v20 = vld [vmem:[%s3941_s26 + $0x50] sm:$0xff] }
  0xca   : > { %1646 = vmatpush1.bf16.msra.mxu0 %v3228_v19  ;;  %1690 = vmatprep.subr.bf16.mxu1 %v3239_v22  ;;  %v350_v19 = vld [vmem:[%s3941_s26 + $0x20] sm:$0xff] }
  0xcb   : > { %1647 = vmatprep.subr.bf16.mxu0 %v3236_v21  ;;  %v3320_v21 = vld [vmem:[#allocation5 + $0x20c] ss:$16 sps:$4 sm:$0xff]   ;;  %v3983_v22 = vpack.c.bf16 %v356_v20, %v350_v19  ;;  %v3408_v19 = vld [vmem:[#allocation5 + $0x5c8] ss:$16 sps:$4 sm:$0xff]  }
  0xcc   : > { %v3413_v20 = vld [vmem:[#allocation5 + $0x5ec] ss:$16 sps:$4 sm:$0xff]  }
  0xcd   : > { %1691 = vmatpush1.bf16.msra.mxu1 %v3237_v24  ;;  %v3323_v24 = vld [vmem:[#allocation5 + $0x22c] ss:$16 sps:$4 sm:$0xff]  }
  0xce   : > { %1648 = vmatpush1.bf16.msra.mxu0 %v3234_v23  ;;  %1692 = vmatprep.subr.bf16.mxu1 %v3245_v26  ;;  %v3318_v23 = vld [vmem:[#allocation5 + $0x208] ss:$16 sps:$4 sm:$0xff]   ;;  %v3326_v26 = vld [vmem:[#allocation5 + $0x24c] ss:$16 sps:$4 sm:$0xff]  }
  0xcf   : > { %1649 = vmatprep.subr.bf16.mxu0 %v3242_v25  ;;  %v3321_v25 = vld [vmem:[#allocation5 + $0x228] ss:$16 sps:$4 sm:$0xff]  }
  0xd1   : > { %1693 = vmatpush1.bf16.msra.mxu1 %v3243_v28  ;;  %v3329_v28 = vld [vmem:[#allocation5 + $0x26c] ss:$16 sps:$4 sm:$0xff]  }
  0xd2   : > { %1650 = vmatpush1.bf16.msra.mxu0 %v3240_v27  ;;  %1694 = vmatprep.subr.bf16.mxu1 %v3251_v30  ;;  %v3324_v27 = vld [vmem:[#allocation5 + $0x248] ss:$16 sps:$4 sm:$0xff]   ;;  %v3332_v30 = vld [vmem:[#allocation5 + $0x28c] ss:$16 sps:$4 sm:$0xff]  }
  0xd3   : > { %1651 = vmatprep.subr.bf16.mxu0 %v3248_v29  ;;  %v3327_v29 = vld [vmem:[#allocation5 + $0x268] ss:$16 sps:$4 sm:$0xff]  }
  0xd5   : > { %1695 = vmatpush1.bf16.msra.mxu1 %v3249_v32  ;;  %v3335_v32 = vld [vmem:[#allocation5 + $0x2ac] ss:$16 sps:$4 sm:$0xff]  }
  0xd6   : > { %1652 = vmatpush1.bf16.msra.mxu0 %v3246_v31  ;;  %1696 = vmatprep.subr.bf16.mxu1 %v3257_v34  ;;  %v3330_v31 = vld [vmem:[#allocation5 + $0x288] ss:$16 sps:$4 sm:$0xff]  }
  0xd7   : > { %1653 = vmatprep.subr.bf16.mxu0 %v3254_v33  ;;  %v3333_v33 = vld [vmem:[#allocation5 + $0x2a8] ss:$16 sps:$4 sm:$0xff]  }
  0xd8   : > { %v3336_v34 = vld [vmem:[#allocation5 + $0x2c8] ss:$16 sps:$4 sm:$0xff]  }
  0xd9   : > { %1697 = vmatpush1.bf16.msra.mxu1 %v3255_v36  ;;  %v3344_v36 = vld [vmem:[#allocation5 + $0x30c] ss:$16 sps:$4 sm:$0xff]  }
  0xda   : > { %1654 = vmatpush1.bf16.msra.mxu0 %v3252_v35  ;;  %1698 = vmatprep.subr.bf16.mxu1 %v3263_v38  ;;  %v3339_v35 = vld [vmem:[#allocation5 + $0x2e8] ss:$16 sps:$4 sm:$0xff]   ;;  %v3347_v38 = vld [vmem:[#allocation5 + $0x32c] ss:$16 sps:$4 sm:$0xff]  }
  0xdb   : > { %1655 = vmatprep.subr.bf16.mxu0 %v3260_v37  ;;  %v3342_v37 = vld [vmem:[#allocation5 + $0x308] ss:$16 sps:$4 sm:$0xff]  }
  0xdd   : > { %1699 = vmatpush1.bf16.msra.mxu1 %v3261_v40  ;;  %v3350_v40 = vld [vmem:[#allocation5 + $0x34c] ss:$16 sps:$4 sm:$0xff]  }
  0xde   : > { %1656 = vmatpush1.bf16.msra.mxu0 %v3258_v39  ;;  %1700 = vmatprep.subr.bf16.mxu1 %v3269_v44  ;;  %v3345_v39 = vld [vmem:[#allocation5 + $0x328] ss:$16 sps:$4 sm:$0xff]   ;;  %v3356_v44 = vld [vmem:[#allocation5 + $0x38c] ss:$16 sps:$4 sm:$0xff]  }
  0xdf   : > { %1657 = vmatprep.subr.bf16.mxu0 %v3266_v41  ;;  %v3348_v41 = vld [vmem:[#allocation5 + $0x348] ss:$16 sps:$4 sm:$0xff]  }
  0xe1   : > { %1701 = vmatpush1.bf16.msra.mxu1 %v3267_v47  ;;  %v3359_v47 = vld [vmem:[#allocation5 + $0x3ac] ss:$16 sps:$4 sm:$0xff]  }
  0xe2   : > { %1658 = vmatpush1.bf16.msra.mxu0 %v3264_v46  ;;  %1702 = vmatprep.subr.bf16.mxu1 %v3275_v49  ;;  %v3354_v46 = vld [vmem:[#allocation5 + $0x388] ss:$16 sps:$4 sm:$0xff]   ;;  %v3362_v49 = vld [vmem:[#allocation5 + $0x3cc] ss:$16 sps:$4 sm:$0xff]  }
  0xe3   : > { %1659 = vmatprep.subr.bf16.mxu0 %v3272_v48  ;;  %v3357_v48 = vld [vmem:[#allocation5 + $0x3a8] ss:$16 sps:$4 sm:$0xff]  }
  0xe5   : > { %1703 = vmatpush1.bf16.msra.mxu1 %v3273_v51  ;;  %v3365_v51 = vld [vmem:[#allocation5 + $0x3ec] ss:$16 sps:$4 sm:$0xff]  }
  0xe6   : > { %1660 = vmatpush1.bf16.msra.mxu0 %v3270_v50  ;;  %1704 = vmatprep.subr.bf16.mxu1 %v3281_v53  ;;  %v3360_v50 = vld [vmem:[#allocation5 + $0x3c8] ss:$16 sps:$4 sm:$0xff]   ;;  %v3368_v53 = vld [vmem:[#allocation5 + $0x40c] ss:$16 sps:$4 sm:$0xff]  }
  0xe7   : > { %1661 = vmatprep.subr.bf16.mxu0 %v3278_v52  ;;  %v3363_v52 = vld [vmem:[#allocation5 + $0x3e8] ss:$16 sps:$4 sm:$0xff]  }
  0xe9   : > { %1705 = vmatpush1.bf16.msra.mxu1 %v3279_v55  ;;  %v3371_v55 = vld [vmem:[#allocation5 + $0x42c] ss:$16 sps:$4 sm:$0xff]  }
  0xea   : > { %1662 = vmatpush1.bf16.msra.mxu0 %v3276_v54  ;;  %1706 = vmatprep.subr.bf16.mxu1 %v3287_v58  ;;  %v3366_v54 = vld [vmem:[#allocation5 + $0x408] ss:$16 sps:$4 sm:$0xff]   ;;  %v3374_v58 = vld [vmem:[#allocation5 + $0x44c] ss:$16 sps:$4 sm:$0xff]  }
  0xeb   : > { %1663 = vmatprep.subr.bf16.mxu0 %v3284_v57  ;;  %v3369_v57 = vld [vmem:[#allocation5 + $0x428] ss:$16 sps:$4 sm:$0xff]  }
  0xed   : > { %1707 = vmatpush1.bf16.msra.mxu1 %v3285_v60  ;;  %v3377_v60 = vld [vmem:[#allocation5 + $0x46c] ss:$16 sps:$4 sm:$0xff]  }
  0xee   : > { %1664 = vmatpush1.bf16.msra.mxu0 %v3282_v59  ;;  %1708 = vmatprep.subr.bf16.mxu1 %v3293_v62  ;;  %v3372_v59 = vld [vmem:[#allocation5 + $0x448] ss:$16 sps:$4 sm:$0xff]   ;;  %v3380_v62 = vld [vmem:[#allocation5 + $0x48c] ss:$16 sps:$4 sm:$0xff]  }
  0xef   : > { %1665 = vmatprep.subr.bf16.mxu0 %v3290_v61  ;;  %v3375_v61 = vld [vmem:[#allocation5 + $0x468] ss:$16 sps:$4 sm:$0xff]  }
  0xf1   : > { %1709 = vmatpush1.bf16.msra.mxu1 %v3291_v0  ;;  %v3383_v0 = vld [vmem:[#allocation5 + $0x4ac] ss:$16 sps:$4 sm:$0xff]  }
  0xf2   : > { %1666 = vmatpush1.bf16.msra.mxu0 %v3288_v63  ;;  %1710 = vmatprep.subr.bf16.mxu1 %v3299_v2  ;;  %v3378_v63 = vld [vmem:[#allocation5 + $0x488] ss:$16 sps:$4 sm:$0xff]   ;;  %v3389_v2 = vld [vmem:[#allocation5 + $0x4ec] ss:$16 sps:$4 sm:$0xff]  }
  0xf3   : > { %1667 = vmatprep.subr.bf16.mxu0 %v3296_v1  ;;  %v3386_v1 = vld [vmem:[#allocation5 + $0x4cc] ss:$16 sps:$4 sm:$0xff]  }
  0xf5   : > { %1711 = vmatpush1.bf16.msra.mxu1 %v3297_v4  ;;  %v3392_v4 = vld [vmem:[#allocation5 + $0x50c] ss:$16 sps:$4 sm:$0xff]  }
  0xf6   : > { %1668 = vmatpush1.bf16.msra.mxu0 %v3294_v3  ;;  %1712 = vmatprep.subr.bf16.mxu1 %v3305_v6  ;;  %v3387_v3 = vld [vmem:[#allocation5 + $0x4e8] ss:$16 sps:$4 sm:$0xff]   ;;  %v3395_v6 = vld [vmem:[#allocation5 + $0x52c] ss:$16 sps:$4 sm:$0xff]  }
  0xf7   : > { %1669 = vmatprep.subr.bf16.mxu0 %v3302_v5  ;;  %v3390_v5 = vld [vmem:[#allocation5 + $0x508] ss:$16 sps:$4 sm:$0xff]  }
  0xf9   : > { %1713 = vmatpush1.bf16.msra.mxu1 %v3303_v8  ;;  %v3398_v8 = vld [vmem:[#allocation5 + $0x54c] ss:$16 sps:$4 sm:$0xff]  }
  0xfa   : > { %1670 = vmatpush1.bf16.msra.mxu0 %v3300_v7  ;;  %1714 = vmatprep.subr.bf16.mxu1 %v3311_v10  ;;  %v3393_v7 = vld [vmem:[#allocation5 + $0x528] ss:$16 sps:$4 sm:$0xff]   ;;  %v3401_v10 = vld [vmem:[#allocation5 + $0x56c] ss:$16 sps:$4 sm:$0xff]  }
  0xfb   : > { %1671 = vmatprep.subr.bf16.mxu0 %v3308_v9  ;;  %v3396_v9 = vld [vmem:[#allocation5 + $0x548] ss:$16 sps:$4 sm:$0xff]  }
  0xfd   : > { %1715 = vmatpush1.bf16.msra.mxu1 %v3309_v12  ;;  %v3404_v12 = vld [vmem:[#allocation5 + $0x58c] ss:$16 sps:$4 sm:$0xff]  }
  0xfe   : > { %1672 = vmatpush1.bf16.msra.mxu0 %v3306_v11  ;;  %1716 = vmatprep.subr.bf16.mxu1 %v3317_v15  ;;  %v3399_v11 = vld [vmem:[#allocation5 + $0x568] ss:$16 sps:$4 sm:$0xff]   ;;  %v3407_v15 = vld [vmem:[#allocation5 + $0x5ac] ss:$16 sps:$4 sm:$0xff]  }
  0xff   : > { %1673 = vmatprep.subr.bf16.mxu0 %v3314_v14  ;;  %v3402_v14 = vld [vmem:[#allocation5 + $0x588] ss:$16 sps:$4 sm:$0xff]  }
 0x101   : > { %1717 = vmatpush1.bf16.msra.mxu1 %v3315_v18  ;;  %v3410_v18 = vld [vmem:[#allocation5 + $0x5cc] ss:$16 sps:$4 sm:$0xff]  }
 0x102   : > { %1674 = vmatpush1.bf16.msra.mxu0 %v3312_v17  ;;  %1729 = vmatprep.subr.bf16.mxu1 %v3320_v21  ;;  %v3405_v17 = vld [vmem:[#allocation5 + $0x5a8] ss:$16 sps:$4 sm:$0xff]  }
 0x103   : > { %v3411_v21 = vld [vmem:[#allocation5 + $0x5e8] ss:$16 sps:$4 sm:$0xff]  }
 0x104   : > { %1719 = vmatmul.mubr.bf16.vlgmr.msra.gmra.mrb[4].mxu1 %v3969_v13  ;;  %v3338_v13 = vld [vmem:[#allocation5 + $0x2cc] ss:$16 sps:$4 sm:$0xff]  }
 0x105   : > { %1676 = vmatmul.mubr.bf16.vlgmr.msra.gmra.mrb[0].mxu0 %v3983_v22  ;;  %1730 = vmatpush1.bf16.msra.mxu1 %v3318_v23 }
 0x106   : > { %1761 = vmatprep.mubr.bf16.mxu1 %v3961_v56  ;;  %1731 = vmatprep.subr.bf16.mxu1 %v3323_v24  ;;  %v3341_v56 = vld [vmem:[#allocation5 + $0x2ec] ss:$16 sps:$4 sm:$0xff]  }
 0x109   : > { %1732 = vmatpush1.bf16.msra.mxu1 %v3321_v25 }
 0x10a   : > { %1733 = vmatprep.subr.bf16.mxu1 %v3326_v26 }
 0x10d   : > { %1734 = vmatpush1.bf16.msra.mxu1 %v3324_v27  ;;  %v561_v27 = vlaneseq }
 0x10e   : > { %1735 = vmatprep.subr.bf16.mxu1 %v3329_v28 }
 0x10f   : > { %v3991_v28 = vshrl.u32 %v561_v27, 7  ;;  %v3431_v27 = vld [vmem:[#allocation8 + $0x54] ss:$8 sps:$4 sm:$0xff]  }
 0x111   : > { %1736 = vmatpush1.bf16.msra.mxu1 %v3327_v29  ;;  %v3994_v29 = vsub.s32 0, %v3991_v28 }
 0x112   : > { %1737 = vmatprep.subr.bf16.mxu1 %v3332_v30  ;;  %v3996_v30 = vld [vmem:[#allocation7] sm:$0x77] }
 0x115   : > { %1738 = vmatpush1.bf16.msra.mxu1 %v3330_v31  ;;  %v3999_v31 = vsub.s32 4, %v3991_v28 }
 0x116   : > { %1739 = vmatprep.subr.bf16.mxu1 %v3335_v32  ;;  %v564_v32 = vrot.slane %v3996_v30, %v3994_v29 }
 0x119   : > { %1740 = vmatpush1.bf16.msra.mxu1 %v3333_v33  ;;  %v584_v33 = vrot.slane %v564_v32, %v3994_v29  ;;  %v3429_v32 = vld [vmem:[#allocation8 + $0x50] ss:$8 sps:$4 sm:$0xff]  }
 0x11a   : > { %1741 = vmatprep.subr.bf16.mxu1 %v3338_v13 }
 0x11d   : > { %1742 = vmatpush1.bf16.msra.mxu1 %v3336_v34 }
 0x11e   : > { %1743 = vmatprep.subr.bf16.mxu1 %v3341_v56 }
 0x121   : > { %1744 = vmatpush1.bf16.msra.mxu1 %v3339_v35 }
 0x122   : > { %1745 = vmatprep.subr.bf16.mxu1 %v3344_v36 }
 0x125   : > { %1746 = vmatpush1.bf16.msra.mxu1 %v3342_v37 }
 0x126   : > { %1747 = vmatprep.subr.bf16.mxu1 %v3347_v38 }
 0x129   : > { %1748 = vmatpush1.bf16.msra.mxu1 %v3345_v39 }
 0x12a   : > { %1749 = vmatprep.subr.bf16.mxu1 %v3350_v40 }
 0x12d   : > { %1750 = vmatpush1.bf16.msra.mxu1 %v3348_v41 }
 0x12e   : > { %1751 = vmatprep.subr.bf16.mxu1 %v3353_v42 }
 0x131   : > { %1752 = vmatpush1.bf16.msra.mxu1 %v3351_v43 }
 0x132   : > { %1753 = vmatprep.subr.bf16.mxu1 %v3356_v44 }
 0x135   : > { %1754 = vmatpush1.bf16.msra.mxu1 %v3354_v46  ;;  %v3414_v46 = vld [vmem:[#allocation8] ss:$8 sps:$4 sm:$0xff]  }
 0x136   : > { %1755 = vmatprep.subr.bf16.mxu1 %v3359_v47  ;;  %v3416_v47 = vld [vmem:[#allocation8 + $0x4] ss:$8 sps:$4 sm:$0xff]  }
 0x137   : > { %2408 = vmatprep.subr.bf16.mxu0 %v3416_v47  ;;  %v3452_v47 = vld [vmem:[#allocation8 + $0xc4] ss:$8 sps:$4 sm:$0xff]  }
 0x138   : > { %2409 = vmatpush1.bf16.msra.mxu0 %v3414_v46  ;;  %v3447_v46 = vld [vmem:[#allocation8 + $0xb0] ss:$8 sps:$4 sm:$0xff]  }
 0x139   : > { %1756 = vmatpush1.bf16.msra.mxu1 %v3357_v48  ;;  %v3419_v48 = vld [vmem:[#allocation8 + $0x14] ss:$8 sps:$4 sm:$0xff]  }
 0x13a   : > { %1757 = vmatprep.subr.bf16.mxu1 %v3362_v49  ;;  %v3417_v49 = vld [vmem:[#allocation8 + $0x10] ss:$8 sps:$4 sm:$0xff]   ;;  %2410 = vmatprep.subr.bf16.mxu0 %v3419_v48  ;;  %v3450_v48 = vld [vmem:[#allocation8 + $0xc0] ss:$8 sps:$4 sm:$0xff]  }
 0x13c   : > { %2411 = vmatpush1.bf16.msra.mxu0 %v3417_v49  ;;  %v3455_v49 = vld [vmem:[#allocation8 + $0xd4] ss:$8 sps:$4 sm:$0xff]  }
 0x13d   : > { %1758 = vmatpush1.bf16.msra.mxu1 %v3360_v50  ;;  %v3422_v50 = vld [vmem:[#allocation8 + $0x24] ss:$8 sps:$4 sm:$0xff]  }
 0x13e   : > { %1759 = vmatprep.subr.bf16.mxu1 %v3365_v51  ;;  %v3420_v51 = vld [vmem:[#allocation8 + $0x20] ss:$8 sps:$4 sm:$0xff]   ;;  %2412 = vmatprep.subr.bf16.mxu0 %v3422_v50  ;;  %v3453_v50 = vld [vmem:[#allocation8 + $0xd0] ss:$8 sps:$4 sm:$0xff]  }
 0x140   : > { %2413 = vmatpush1.bf16.msra.mxu0 %v3420_v51  ;;  %v3458_v51 = vld [vmem:[#allocation8 + $0xe4] ss:$8 sps:$4 sm:$0xff]  }
 0x141   : > { %1760 = vmatpush1.bf16.msra.mxu1 %v3363_v52  ;;  %v3425_v52 = vld [vmem:[#allocation8 + $0x34] ss:$8 sps:$4 sm:$0xff]  }
 0x142   : > { %1772 = vmatprep.subr.bf16.mxu1 %v3368_v53  ;;  %v3423_v53 = vld [vmem:[#allocation8 + $0x30] ss:$8 sps:$4 sm:$0xff]   ;;  %2414 = vmatprep.subr.bf16.mxu0 %v3425_v52  ;;  %v3456_v52 = vld [vmem:[#allocation8 + $0xe0] ss:$8 sps:$4 sm:$0xff]  }
 0x144   : > { %1762 = vmatmul.mubr.bf16.vlgmr.msra.gmra.mrb[4].mxu1 %v3971_v16  ;;  %v3381_v16 = vld [vmem:[#allocation5 + $0x4a8] ss:$16 sps:$4 sm:$0xff]   ;;  %2415 = vmatpush1.bf16.msra.mxu0 %v3423_v53  ;;  %v3461_v53 = vld [vmem:[#allocation8 + $0xf4] ss:$8 sps:$4 sm:$0xff]  }
 0x145   : > { %1773 = vmatpush1.bf16.msra.mxu1 %v3366_v54  ;;  %1804 = vmatprep.mubr.bf16.mxu1 %v3978_v45  ;;  %v3384_v45 = vld [vmem:[#allocation5 + $0x4c8] ss:$16 sps:$4 sm:$0xff]  }
 0x146   : > { %1774 = vmatprep.subr.bf16.mxu1 %v3371_v55  ;;  %v4015_v54 = vld [vmem:[#allocation7 + $0x8] sm:$0x77] }
 0x147   : > { %v572_v55 = vrot.slane %v4015_v54, %v3994_v29 }
 0x149   : > { %1775 = vmatpush1.bf16.msra.mxu1 %v3369_v57  ;;  %v576_v57 = vrot.slane %v4015_v54, %v3999_v31 }
 0x14a   : > { %1776 = vmatprep.subr.bf16.mxu1 %v3374_v58  ;;  %v592_v58 = vrot.slane %v572_v55, %v3994_v29  ;;  %v3459_v55 = vld [vmem:[#allocation8 + $0xf0] ss:$8 sps:$4 sm:$0xff]  }
 0x14d   : > { %1777 = vmatpush1.bf16.msra.mxu1 %v3372_v59  ;;  %v596_v59 = vrot.slane %v576_v57, %v3994_v29  ;;  %v3464_v57 = vld [vmem:[#allocation8 + $0x104] ss:$8 sps:$4 sm:$0xff]  }
 0x14e   : > { %1778 = vmatprep.subr.bf16.mxu1 %v3377_v60 }
 0x151   : > { %1779 = vmatpush1.bf16.msra.mxu1 %v3375_v61 }
 0x152   : > { %1780 = vmatprep.subr.bf16.mxu1 %v3380_v62 }
 0x155   : > { %1781 = vmatpush1.bf16.msra.mxu1 %v3378_v63 }
 0x156   : > { %1782 = vmatprep.subr.bf16.mxu1 %v3383_v0 }
 0x159   : > { %1783 = vmatpush1.bf16.msra.mxu1 %v3381_v16 }
 0x15a   : > { %1784 = vmatprep.subr.bf16.mxu1 %v3386_v1 }
 0x15d   : > { %1785 = vmatpush1.bf16.msra.mxu1 %v3384_v45 }
 0x15e   : > { %1786 = vmatprep.subr.bf16.mxu1 %v3389_v2 }
 0x161   : > { %1787 = vmatpush1.bf16.msra.mxu1 %v3387_v3 }
 0x162   : > { %1788 = vmatprep.subr.bf16.mxu1 %v3392_v4 }
 0x165   : > { %1789 = vmatpush1.bf16.msra.mxu1 %v3390_v5 }
 0x166   : > { %1790 = vmatprep.subr.bf16.mxu1 %v3395_v6 }
 0x169   : > { %1791 = vmatpush1.bf16.msra.mxu1 %v3393_v7 }
 0x16a   : > { %1792 = vmatprep.subr.bf16.mxu1 %v3398_v8 }
 0x16d   : > { %1793 = vmatpush1.bf16.msra.mxu1 %v3396_v9 }
 0x16e   : > { %1794 = vmatprep.subr.bf16.mxu1 %v3401_v10 }
 0x171   : > { %1795 = vmatpush1.bf16.msra.mxu1 %v3399_v11 }
 0x172   : > { %1796 = vmatprep.subr.bf16.mxu1 %v3404_v12 }
 0x175   : > { %1797 = vmatpush1.bf16.msra.mxu1 %v3402_v14 }
 0x176   : > { %1798 = vmatprep.subr.bf16.mxu1 %v3407_v15 }
 0x179   : > { %1799 = vmatpush1.bf16.msra.mxu1 %v3405_v17 }
 0x17a   : > { %1800 = vmatprep.subr.bf16.mxu1 %v3410_v18 }
 0x17d   : > { %1801 = vmatpush1.bf16.msra.mxu1 %v3408_v19 }
 0x17e   : > { %1802 = vmatprep.subr.bf16.mxu1 %v3413_v20 }
 0x181   : > { %1803 = vmatpush1.bf16.msra.mxu1 %v3411_v21 }
 0x184   : > { %1805 = vmatmul.mubr.bf16.vlgmr.msra.gmra.mrb[4].mxu1 %v3983_v22  ;;  %v568_v22 = vrot.slane %v3996_v30, %v3999_v31 }
 0x186   : > { %v588_v13 = vrot.slane %v568_v22, %v3994_v29  ;;  %v3434_v22 = vld [vmem:[#allocation8 + $0x64] ss:$8 sps:$4 sm:$0xff]  }
 0x197   : > { %v1591_v23 = vpop.f32.mrb[0].mxu1 }
 0x198   : > { %v1593_v24 = vpop.f32.mrb[1].mxu1  ;;  %v1592_v34 = vadd.f32 %v1591_v23, %v584_v33 }
 0x199   : > { %v1595_v25 = vpop.f32.mrb[2].mxu1  ;;  %v1594_v56 = vadd.f32 %v1593_v24, %v588_v13 }
 0x19a   : > { %v1597_v26 = vpop.f32.mrb[3].mxu1  ;;  %v1596_v36 = vadd.f32 %v1595_v25, %v584_v33  ;;  %v3428_v25 = vld [vmem:[#allocation8 + $0x44] ss:$8 sps:$4 sm:$0xff]   ;;  %v3432_v33 = vld [vmem:[#allocation8 + $0x60] ss:$8 sps:$4 sm:$0xff]  }
 0x19b   : > { %v1598_v39 = vadd.f32 %v1597_v26, %v588_v13  ;;  %v3426_v26 = vld [vmem:[#allocation8 + $0x40] ss:$8 sps:$4 sm:$0xff]   ;;  %2416 = vmatprep.subr.bf16.mxu0 %v3428_v25  ;;  %v3437_v13 = vld [vmem:[#allocation8 + $0x74] ss:$8 sps:$4 sm:$0xff]  }
 0x19c   : > { %2417 = vmatpush1.bf16.msra.mxu0 %v3426_v26 }
 0x19d   : > { %2418 = vmatprep.subr.bf16.mxu0 %v3431_v27 }
 0x1a0   : > { %2419 = vmatpush1.bf16.msra.mxu0 %v3429_v32 }
 0x1a1   : > { %2420 = vmatprep.subr.bf16.mxu0 %v3434_v22 }
 0x1a4   : > { %2421 = vmatpush1.bf16.msra.mxu0 %v3432_v33 }
 0x1a5   : > { %2422 = vmatprep.subr.bf16.mxu0 %v3437_v13 }
 0x1d8   : > { %v1677_v35 = vpop.f32.mrb[0].mxu0 }
 0x1d9   : > { %v4007_v37 = vadd.f32 %v1677_v35, %v1592_v34  ;;  %v1679_v38 = vpop.f32.mrb[1].mxu0  ;;  %v3435_v34 = vld [vmem:[#allocation8 + $0x70] ss:$8 sps:$4 sm:$0xff]   ;;  %v3438_v35 = vld [vmem:[#allocation8 + $0x80] ss:$8 sps:$4 sm:$0xff]  }
 0x1da   : > { %v4009_v40 = vadd.f32 %v1679_v38, %v1594_v56  ;;  %v1681_v41 = vpop.f32.mrb[2].mxu0  ;;  %v3440_v56 = vld [vmem:[#allocation8 + $0x84] ss:$8 sps:$4 sm:$0xff]   ;;  %2423 = vmatpush1.bf16.msra.mxu0 %v3435_v34  ;;  %v3441_v38 = vld [vmem:[#allocation8 + $0x90] ss:$8 sps:$4 sm:$0xff]  }
 0x1db   : > { %v4011_v42 = vadd.f32 %v1681_v41, %v1596_v36  ;;  %v1683_v43 = vpop.f32.mrb[3].mxu0  ;;  %v1827_v60 = vmul.f32 %v4007_v37, %v4007_v37  ;;  %2424 = vmatprep.subr.bf16.mxu0 %v3440_v56  ;;  %v3443_v36 = vld [vmem:[#allocation8 + $0x94] ss:$8 sps:$4 sm:$0xff]   ;;  %v3444_v41 = vld [vmem:[#allocation8 + $0xa0] ss:$8 sps:$4 sm:$0xff]  }
 0x1dc   : > { %v4013_v44 = vadd.f32 %v1683_v43, %v1598_v39  ;;  %v1828_v61 = vmul.f32 %v4009_v40, %v4009_v40  ;;  %v1815_v45 = vadd.f32 %v4009_v40, %v4007_v37  ;;  %v3446_v39 = vld [vmem:[#allocation8 + $0xa4] ss:$8 sps:$4 sm:$0xff]   ;;  %v3449_v43 = vld [vmem:[#allocation8 + $0xb4] ss:$8 sps:$4 sm:$0xff]  }
 0x1dd   : > { %v1831_v62 = vmul.f32 %v4011_v42, %v4011_v42 }
 0x1de   : > { %v1832_v63 = vmul.f32 %v4013_v44, %v4013_v44  ;;  %v1820_v2 = vadd.f32 %v4013_v44, %v4011_v42  ;;  %v1835_v9 = vadd.f32 %v1828_v61, %v1827_v60  ;;  %2425 = vmatpush1.bf16.msra.mxu0 %v3438_v35 }
 0x1df   : > { %2426 = vmatprep.subr.bf16.mxu0 %v3443_v36 }
 0x1e0   : > { %v1840_v12 = vadd.f32 %v1832_v63, %v1831_v62 }
 0x1e2   : > { %2427 = vmatpush1.bf16.msra.mxu0 %v3441_v38 }
 0x1e3   : > { %2428 = vmatprep.subr.bf16.mxu0 %v3446_v39 }
 0x1e6   : > { %2429 = vmatpush1.bf16.msra.mxu0 %v3444_v41 }
 0x1e7   : > { %2430 = vmatprep.subr.bf16.mxu0 %v3449_v43 }
 0x1ea   : > { %2431 = vmatpush1.bf16.msra.mxu0 %v3447_v46 }
 0x1eb   : > { %2432 = vmatprep.subr.bf16.mxu0 %v3452_v47 }
 0x1ee   : > { %2433 = vmatpush1.bf16.msra.mxu0 %v3450_v48 }
 0x1ef   : > { %2434 = vmatprep.subr.bf16.mxu0 %v3455_v49 }
 0x1f2   : > { %2435 = vmatpush1.bf16.msra.mxu0 %v3453_v50 }
 0x1f3   : > { %2436 = vmatprep.subr.bf16.mxu0 %v3458_v51 }
 0x1f6   : > { %2437 = vmatpush1.bf16.msra.mxu0 %v3456_v52 }
 0x1f7   : > { %2438 = vmatprep.subr.bf16.mxu0 %v3461_v53 }
 0x1fa   : > { %2439 = vmatpush1.bf16.msra.mxu0 %v3459_v55 }
 0x1fb   : > { %2451 = vmatprep.subr.bf16.mxu0 %v3464_v57 }
 0x257   : > { %v1806_v0 = vpop.f32.mrb[4].mxu1 }
 0x258   : > { %v4031_v16 = vadd.f32 %v1806_v0, %v592_v58  ;;  %v1808_v1 = vpop.f32.mrb[5].mxu1 }
 0x259   : > { %v4037_v3 = vadd.f32 %v1808_v1, %v596_v59  ;;  %v1810_v4 = vpop.f32.mrb[6].mxu1 }
 0x25a   : > { %v4039_v5 = vadd.f32 %v1810_v4, %v592_v58  ;;  %v1812_v6 = vpop.f32.mrb[7].mxu1  ;;  %v1816_v7 = vadd.f32 %v4031_v16, %v1815_v45  ;;  %v1829_v8 = vmul.f32 %v4031_v16, %v4031_v16 }
 0x25b   : > { %v4044_v10 = vadd.f32 %v1812_v6, %v596_v59  ;;  %v1830_v11 = vmul.f32 %v4037_v3, %v4037_v3 }
 0x25c   : > { %v1833_v14 = vmul.f32 %v4039_v5, %v4039_v5  ;;  %v1817_v15 = vadd.f32 %v4037_v3, %v1816_v7  ;;  %v1836_v17 = vadd.f32 %v1835_v9, %v1829_v8  ;;  %v1821_v18 = vadd.f32 %v4039_v5, %v1820_v2 }
 0x25d   : > { %v1834_v20 = vmul.f32 %v4044_v10, %v4044_v10  ;;  %v4056_v9 = vsub.s32 1, %v3991_v28 }
 0x25e   : > { %1818 = vadd.xlane.f32.xlu0 %v1817_v15  ;;  %v1837_v19 = vadd.f32 %v1836_v17, %v1830_v11  ;;  %v1841_v21 = vadd.f32 %v1840_v12, %v1833_v14  ;;  %v1822_v23 = vadd.f32 %v4044_v10, %v1821_v18  ;;  %v4059_v12 = vsub.s32 5, %v3991_v28 }
 0x25f   : > { %v4062_v14 = vsub.s32 2, %v3991_v28  ;;  %v4065_v17 = vsub.s32 6, %v3991_v28  ;;  %v1884_v28 = vrot.slane %v4015_v54, %v4056_v9 }
 0x260   : > { %1838 = vadd.xlane.f32.xlu1 %v1837_v19  ;;  %v1842_v24 = vadd.f32 %v1841_v21, %v1834_v20  ;;  %v1880_v18 = vrot.slane %v3996_v30, %v4059_v12  ;;  %v1876_v19 = vrot.slane %v3996_v30, %v4056_v9  ;;  %v1888_v20 = vrot.slane %v4015_v54, %v4059_v12 }
 0x261   : > { %v1924_v21 = vrot.slane %v3996_v30, %v4065_v17  ;;  %v1932_v27 = vrot.slane %v4015_v54, %v4065_v17  ;;  %v1904_v35 = vrot.slane %v1884_v28, %v4056_v9  ;;  %v1928_v36 = vrot.slane %v4015_v54, %v4062_v14 }
 0x262   : > { %1823 = vadd.xlane.f32.xlu0 %v1822_v23  ;;  %v1920_v23 = vrot.slane %v3996_v30, %v4062_v14  ;;  %v1896_v25 = vrot.slane %v1876_v19, %v4056_v9  ;;  %v1908_v26 = vrot.slane %v1888_v20, %v4056_v9 }
 0x263   : > { %v1944_v34 = vrot.slane %v1924_v21, %v4062_v14  ;;  %v1948_v54 = vrot.slane %v1928_v36, %v4062_v14 }
 0x264   : > { %1843 = vadd.xlane.f32.xlu1 %v1842_v24  ;;  %v1900_v24 = vrot.slane %v1880_v18, %v4056_v9  ;;  %v1940_v56 = vrot.slane %v1920_v23, %v4062_v14 }
 0x2eb   : > { %v1819_v58 = vpop.xlane.xlu0 %1818 }
 0x2ec   : > { %v1825_v59 = vmul.f32 0.001953125, %v1819_v58 }
 0x2ed   : > { %v1839_v60 = vpop.xlane.xlu1 %1838 }
 0x2ee   : > { %v1845_v61 = vmul.f32 0.001953125, %v1839_v60  ;;  %v1847_v62 = vmul.f32 %v1825_v59, %v1825_v59  ;;  %v1853_v32 = vsub.f32 %v4007_v37, %v1825_v59  ;;  %v1854_v22 = vsub.f32 %v4009_v40, %v1825_v59 }
 0x2ef   : > { %v1824_v63 = vpop.xlane.xlu0 %1823  ;;  %v1855_v33 = vsub.f32 %v4031_v16, %v1825_v59  ;;  %v1856_v30 = vsub.f32 %v4037_v3, %v1825_v59  ;;  %v1952_v16 = vrot.slane %v1932_v27, %v4062_v14 }
 0x2f0   : > { %v1826_v0 = vmul.f32 0.001953125, %v1824_v63  ;;  %v1849_v1 = vsub.f32 %v1845_v61, %v1847_v62 }
 0x2f1   : > { %v1844_v45 = vpop.xlane.xlu1 %1843 }
 0x2f2   : > { %v1851_v2 = vmax.f32 %v1849_v1, 0.0  ;;  %v1846_v4 = vmul.f32 0.001953125, %v1844_v45  ;;  %v1848_v6 = vmul.f32 %v1826_v0, %v1826_v0  ;;  %v1857_v40 = vsub.f32 %v4011_v42, %v1826_v0 }
 0x2f3   : > { %v1858_v3 = vsub.f32 %v4013_v44, %v1826_v0  ;;  %v1859_v49 = vsub.f32 %v4039_v5, %v1826_v0  ;;  %v1860_v50 = vsub.f32 %v4044_v10, %v1826_v0 }
 0x2f4   : > { %v1861_v7 = vadd.f32 1e-05, %v1851_v2  ;;  %v1850_v8 = vsub.f32 %v1846_v4, %v1848_v6 }
 0x2f6   : > { %3510 = vrsqrt.f32 %v1861_v7  ;;  %v1852_v11 = vmax.f32 %v1850_v8, 0.0 }
 0x2f8   : > { %v1862_v15 = vadd.f32 1e-05, %v1852_v11 }
 0x2fa   : > { %3512 = vrsqrt.f32 %v1862_v15 }
 0x300   : > { %v3511_v13 = vpop.eup %3510 }
 0x301   : > { %v1866_v38 = vmul.f32 %v3511_v13, %v1854_v22  ;;  %v1865_v39 = vmul.f32 %v3511_v13, %v1853_v32  ;;  %v1868_v41 = vmul.f32 %v3511_v13, %v1856_v30  ;;  %v1867_v37 = vmul.f32 %v3511_v13, %v1855_v33 }
 0x303   : > { %v1910_v43 = vmul.f32 %v1900_v24, %v1866_v38  ;;  %v1909_v46 = vmul.f32 %v1896_v25, %v1865_v39  ;;  %v1912_v47 = vmul.f32 %v1908_v26, %v1868_v41  ;;  %v1911_v51 = vmul.f32 %v1904_v35, %v1867_v37 }
 0x304   : > { %v3513_v48 = vpop.eup %3512 }
 0x305   : > { %v1870_v52 = vmul.f32 %v3513_v48, %v1858_v3  ;;  %v1954_v53 = vadd.f32 %v1944_v34, %v1910_v43  ;;  %v1869_v55 = vmul.f32 %v3513_v48, %v1857_v40  ;;  %v1953_v57 = vadd.f32 %v1940_v56, %v1909_v46 }
 0x306   : > { %v1872_v42 = vmul.f32 %v3513_v48, %v1860_v50  ;;  %v1956_v58 = vadd.f32 %v1952_v16, %v1912_v47  ;;  %v1871_v59 = vmul.f32 %v3513_v48, %v1859_v49  ;;  %v1955_v1 = vadd.f32 %v1948_v54, %v1911_v51  ;;  %v3462_v47 = vld [vmem:[#allocation8 + $0x100] ss:$8 sps:$4 sm:$0xff]  }
 0x307   : > { %v1914_v60 = vmul.f32 %v1900_v24, %v1870_v52  ;;  %v1970_v44 = vmul.f32 0.70710677, %v1954_v53  ;;  %v1913_v61 = vmul.f32 %v1896_v25, %v1869_v55  ;;  %v1969_v62 = vmul.f32 0.70710677, %v1953_v57 }
 0x308   : > { %v1916_v63 = vmul.f32 %v1908_v26, %v1872_v42  ;;  %v1972_v10 = vmul.f32 0.70710677, %v1956_v58  ;;  %v1915_v2 = vmul.f32 %v1904_v35, %v1871_v59  ;;  %v1971_v11 = vmul.f32 0.70710677, %v1955_v1  ;;  %v3468_v59 = vld [vmem:[#allocation8 + $0x120] ss:$8 sps:$4 sm:$0xff]  }
 0x309   : > { %v1958_v45 = vadd.f32 %v1944_v34, %v1914_v60  ;;  %3514 = verf.f32 %v1970_v44  ;;  %v1957_v5 = vadd.f32 %v1940_v56, %v1913_v61  ;;  %v1962_v28 = vmul.f32 0.5, %v1954_v53  ;;  %v3473_v60 = vld [vmem:[#allocation8 + $0x134] ss:$8 sps:$4 sm:$0xff]   ;;  %v3471_v44 = vld [vmem:[#allocation8 + $0x130] ss:$8 sps:$4 sm:$0xff]  }
 0x30a   : > { %3516 = verf.f32 %v1969_v62  ;;  %v1960_v0 = vadd.f32 %v1952_v16, %v1916_v63  ;;  %v1959_v8 = vadd.f32 %v1948_v54, %v1915_v2  ;;  %v1961_v32 = vmul.f32 0.5, %v1953_v57  ;;  %v3467_v54 = vld [vmem:[#allocation8 + $0x114] ss:$8 sps:$4 sm:$0xff]   ;;  %v3465_v57 = vld [vmem:[#allocation8 + $0x110] ss:$8 sps:$4 sm:$0xff]  }
 0x30b   : > { %v1974_v4 = vmul.f32 0.70710677, %v1958_v45  ;;  %v1973_v6 = vmul.f32 0.70710677, %v1957_v5  ;;  %3518 = verf.f32 %v1972_v10  ;;  %v1966_v26 = vmul.f32 0.5, %v1958_v45 }
 0x30c   : > { %v1976_v7 = vmul.f32 0.70710677, %v1960_v0  ;;  %v1975_v15 = vmul.f32 0.70710677, %v1959_v8  ;;  %v1965_v30 = vmul.f32 0.5, %v1957_v5  ;;  %v1964_v34 = vmul.f32 0.5, %v1956_v58 }
 0x30d   : > { %3520 = verf.f32 %v1974_v4  ;;  %v1963_v56 = vmul.f32 0.5, %v1955_v1  ;;  %v1968_v39 = vmul.f32 0.5, %v1960_v0  ;;  %v1967_v3 = vmul.f32 0.5, %v1959_v8  ;;  %v3470_v58 = vld [vmem:[#allocation8 + $0x124] ss:$8 sps:$4 sm:$0xff]  }
 0x30e   : > { %3522 = verf.f32 %v1973_v6  ;;  %v3476_v61 = vld [vmem:[#allocation8 + $0x144] ss:$8 sps:$4 sm:$0xff]   ;;  %v3474_v62 = vld [vmem:[#allocation8 + $0x140] ss:$8 sps:$4 sm:$0xff]   ;;  %v3479_v63 = vld [vmem:[#allocation8 + $0x154] ss:$8 sps:$4 sm:$0xff]  }
 0x30f   : > { %3524 = verf.f32 %v1976_v7  ;;  %v3477_v1 = vld [vmem:[#allocation8 + $0x150] ss:$8 sps:$4 sm:$0xff]   ;;  %v3482_v45 = vld [vmem:[#allocation8 + $0x164] ss:$8 sps:$4 sm:$0xff]   ;;  %v3480_v5 = vld [vmem:[#allocation8 + $0x160] ss:$8 sps:$4 sm:$0xff]  }
 0x310   : > { %3526 = verf.f32 %v1971_v11  ;;  %v3485_v10 = vld [vmem:[#allocation8 + $0x174] ss:$8 sps:$4 sm:$0xff]   ;;  %v3483_v0 = vld [vmem:[#allocation8 + $0x170] ss:$8 sps:$4 sm:$0xff]   ;;  %v3488_v2 = vld [vmem:[#allocation8 + $0x184] ss:$8 sps:$4 sm:$0xff]  }
 0x311   : > { %3528 = verf.f32 %v1975_v15  ;;  %v3486_v4 = vld [vmem:[#allocation8 + $0x180] ss:$8 sps:$4 sm:$0xff]   ;;  %v3491_v6 = vld [vmem:[#allocation8 + $0x194] ss:$8 sps:$4 sm:$0xff]   ;;  %v3489_v7 = vld [vmem:[#allocation8 + $0x190] ss:$8 sps:$4 sm:$0xff]  }
 0x312   : > { %v3494_v8 = vld [vmem:[#allocation8 + $0x1a4] ss:$8 sps:$4 sm:$0xff]   ;;  %v3492_v11 = vld [vmem:[#allocation8 + $0x1a0] ss:$8 sps:$4 sm:$0xff]   ;;  %v3497_v15 = vld [vmem:[#allocation8 + $0x1b4] ss:$8 sps:$4 sm:$0xff]  }
 0x313   : > { %v3515_v18 = vpop.eup %3514 }
 0x314   : > { %v3517_v19 = vpop.eup %3516  ;;  %v1986_v21 = vadd.f32 1.0, %v3515_v18  ;;  %v3495_v18 = vld [vmem:[#allocation8 + $0x1b0] ss:$8 sps:$4 sm:$0xff]  }
 0x315   : > { %v3519_v20 = vpop.eup %3518  ;;  %v1985_v24 = vadd.f32 1.0, %v3517_v19  ;;  %v3500_v19 = vld [vmem:[#allocation8 + $0x1c4] ss:$8 sps:$4 sm:$0xff]  }
 0x316   : > { %v1988_v22 = vadd.f32 1.0, %v3519_v20  ;;  %v1994_v36 = vmul.f32 %v1986_v21, %v1962_v28  ;;  %v3498_v20 = vld [vmem:[#allocation8 + $0x1c0] ss:$8 sps:$4 sm:$0xff]   ;;  %v3503_v21 = vld [vmem:[#allocation8 + $0x1d4] ss:$8 sps:$4 sm:$0xff]  }
 0x317   : > { %v3521_v23 = vpop.eup %3520  ;;  %v1993_v40 = vmul.f32 %v1985_v24, %v1961_v32  ;;  %v3506_v28 = vld [vmem:[#allocation8 + $0x1e4] ss:$8 sps:$4 sm:$0xff]   ;;  %v3504_v24 = vld [vmem:[#allocation8 + $0x1e0] ss:$8 sps:$4 sm:$0xff]  }
 0x318   : > { %v3523_v25 = vpop.eup %3522  ;;  %v1990_v27 = vadd.f32 1.0, %v3521_v23  ;;  %v1996_v48 = vmul.f32 %v1988_v22, %v1964_v34  ;;  %v3501_v23 = vld [vmem:[#allocation8 + $0x1d0] ss:$8 sps:$4 sm:$0xff]  }
 0x319   : > { %v3525_v33 = vpop.eup %3524  ;;  %v1989_v13 = vadd.f32 1.0, %v3523_v25  ;;  %v3509_v25 = vld [vmem:[#allocation8 + $0x1f4] ss:$8 sps:$4 sm:$0xff]  }
 0x31a   : > { %v3527_v35 = vpop.eup %3526  ;;  %v1998_v38 = vmul.f32 %v1990_v27, %v1966_v26  ;;  %v1992_v41 = vadd.f32 1.0, %v3525_v33  ;;  %v3507_v26 = vld [vmem:[#allocation8 + $0x1f0] ss:$8 sps:$4 sm:$0xff]  }
 0x31b   : > { %v3529_v37 = vpop.eup %3528  ;;  %v1997_v16 = vmul.f32 %v1989_v13, %v1965_v30  ;;  %v1987_v43 = vadd.f32 1.0, %v3527_v35  ;;  %v360_v27 = vld [vmem:[%s4147_s4] sm:$0x77] }
 0x31c   : > { %v2002_v46 = vpack.c.bf16 %v1998_v38, %v1994_v36  ;;  %v2000_v49 = vmul.f32 %v1992_v41, %v1968_v39  ;;  %v1991_v50 = vadd.f32 1.0, %v3529_v37  ;;  %v2073_v32 = vrot.slane %v360_v27, %v3994_v29 }
 0x31d   : > { %v2001_v51 = vpack.c.bf16 %v1997_v16, %v1993_v40  ;;  %v4099_v53 = vmul.f32 %v1987_v43, %v1963_v56  ;;  %v2077_v22 = vrot.slane %v360_v27, %v3999_v31 }
 0x31e   : > { %2440 = vmatprep.mubr.bf16.mxu0 %v2002_v46  ;;  %v2004_v52 = vpack.c.bf16 %v2000_v49, %v1996_v48  ;;  %v4101_v55 = vmul.f32 %v1991_v50, %v1967_v3  ;;  %v2083_v33 = vrot.slane %v2073_v32, %v3994_v29 }
 0x31f   : > { %2441 = vmatmul.mubr.bf16.vlgmr.msra.gmra.mrb[4].mxu0 %v2001_v51  ;;  %v2087_v30 = vrot.slane %v2077_v22, %v3994_v29 }
 0x320   : > { %2452 = vmatpush1.bf16.msra.mxu0 %v3462_v47  ;;  %2483 = vmatprep.mubr.bf16.mxu0 %v2004_v52  ;;  %v2003_v42 = vpack.c.bf16 %v4101_v55, %v4099_v53 }
 0x321   : > { %2453 = vmatprep.subr.bf16.mxu0 %v3467_v54 }
 0x324   : > { %2454 = vmatpush1.bf16.msra.mxu0 %v3465_v57 }
 0x325   : > { %2455 = vmatprep.subr.bf16.mxu0 %v3470_v58 }
 0x328   : > { %2456 = vmatpush1.bf16.msra.mxu0 %v3468_v59 }
 0x329   : > { %2457 = vmatprep.subr.bf16.mxu0 %v3473_v60 }
 0x32c   : > { %2458 = vmatpush1.bf16.msra.mxu0 %v3471_v44 }
 0x32d   : > { %2459 = vmatprep.subr.bf16.mxu0 %v3476_v61 }
 0x330   : > { %2460 = vmatpush1.bf16.msra.mxu0 %v3474_v62 }
 0x331   : > { %2461 = vmatprep.subr.bf16.mxu0 %v3479_v63  ;;  %v2535_v63 = vrot.slane %v360_v27, %v4056_v9 }
 0x334   : > { %2462 = vmatpush1.bf16.msra.mxu0 %v3477_v1  ;;  %v2539_v1 = vrot.slane %v360_v27, %v4059_v12 }
 0x335   : > { %2463 = vmatprep.subr.bf16.mxu0 %v3482_v45  ;;  %v2557_v45 = vrot.slane %v360_v27, %v4062_v14 }
 0x338   : > { %2464 = vmatpush1.bf16.msra.mxu0 %v3480_v5  ;;  %v2561_v5 = vrot.slane %v360_v27, %v4065_v17 }
 0x339   : > { %2465 = vmatprep.subr.bf16.mxu0 %v3485_v10 }
 0x33c   : > { %2466 = vmatpush1.bf16.msra.mxu0 %v3483_v0 }
 0x33d   : > { %2467 = vmatprep.subr.bf16.mxu0 %v3488_v2  ;;  %v2545_v2 = vrot.slane %v2535_v63, %v4056_v9 }
 0x340   : > { %2468 = vmatpush1.bf16.msra.mxu0 %v3486_v4  ;;  %v2549_v4 = vrot.slane %v2539_v1, %v4056_v9 }
 0x341   : > { %2469 = vmatprep.subr.bf16.mxu0 %v3491_v6 }
 0x344   : > { %2470 = vmatpush1.bf16.msra.mxu0 %v3489_v7  ;;  %v2567_v7 = vrot.slane %v2557_v45, %v4062_v14 }
 0x345   : > { %2471 = vmatprep.subr.bf16.mxu0 %v3494_v8  ;;  %v2571_v8 = vrot.slane %v2561_v5, %v4062_v14 }
 0x348   : > { %2472 = vmatpush1.bf16.msra.mxu0 %v3492_v11 }
 0x349   : > { %2473 = vmatprep.subr.bf16.mxu0 %v3497_v15 }
 0x34c   : > { %2474 = vmatpush1.bf16.msra.mxu0 %v3495_v18 }
 0x34d   : > { %2475 = vmatprep.subr.bf16.mxu0 %v3500_v19 }
 0x350   : > { %2476 = vmatpush1.bf16.msra.mxu0 %v3498_v20 }
 0x351   : > { %2477 = vmatprep.subr.bf16.mxu0 %v3503_v21 }
 0x354   : > { %2478 = vmatpush1.bf16.msra.mxu0 %v3501_v23 }
 0x355   : > { %2479 = vmatprep.subr.bf16.mxu0 %v3506_v28 }
 0x358   : > { %2480 = vmatpush1.bf16.msra.mxu0 %v3504_v24 }
 0x359   : > { %2481 = vmatprep.subr.bf16.mxu0 %v3509_v25 }
 0x35c   : > { %2482 = vmatpush1.bf16.msra.mxu0 %v3507_v26 }
 0x35f   : > { %2484 = vmatmul.mubr.bf16.vlgmr.msra.gmra.mrb[4].mxu0 %v2003_v42 }
 0x432   : > { %v2485_v13 = vpop.f32.mrb[4].mxu0 }
 0x433   : > { %v3027_v34 = vadd.f32 %v2485_v13, %v2083_v33  ;;  %v2487_v56 = vpop.f32.mrb[5].mxu0  ;;  %v2596_v13 = vld [vmem:[%s4148_s5] sm:$0x3] }
 0x434   : > { %v3028_v35 = vadd.f32 %v2487_v56, %v2087_v30  ;;  %v2489_v36 = vpop.f32.mrb[6].mxu0 }
 0x435   : > { %v3029_v38 = vadd.f32 %v2489_v36, %v2083_v33  ;;  %v2491_v39 = vpop.f32.mrb[7].mxu0  ;;  %v2502_v40 = vmul.f32 %v3027_v34, %v3027_v34 }
 0x436   : > { %v3030_v41 = vadd.f32 %v2491_v39, %v2087_v30  ;;  %v2494_v37 = vadd.f32 %v3028_v35, %v3027_v34  ;;  %v2503_v16 = vmul.f32 %v3028_v35, %v3028_v35 }
 0x437   : > { %v2504_v43 = vmul.f32 %v3029_v38, %v3029_v38 }
 0x438   : > { %2495 = vadd.xlane.f32.xlu0 %v2494_v37  ;;  %v2497_v3 = vadd.f32 %v3030_v41, %v3029_v38  ;;  %v2505_v46 = vmul.f32 %v3030_v41, %v3030_v41  ;;  %v2506_v31 = vadd.f32 %v2503_v16, %v2502_v40  ;;  %v2605_v37 = vrot.slane %v2596_v13, %v4056_v9  ;;  %v3010_v9 = vld [vmem:[#allocation2] ss:$0 sm:$0xff] }
 0x43a   : > { %2498 = vadd.xlane.f32.xlu1 %v2497_v3  ;;  %v2509_v47 = vadd.f32 %v2505_v46, %v2504_v43 }
 0x43c   : > { %2507 = vadd.xlane.f32.xlu0 %v2506_v31 }
 0x43e   : > { %2510 = vadd.xlane.f32.xlu1 %v2509_v47 }
 0x4c5   : > { %v2496_v48 = vpop.xlane.xlu0 %2495 }
 0x4c6   : > { %v2500_v49 = vmul.f32 0.00390625, %v2496_v48 }
 0x4c7   : > { %v2499_v50 = vpop.xlane.xlu1 %2498 }
 0x4c8   : > { %v2501_v51 = vmul.f32 0.00390625, %v2499_v50  ;;  %v2514_v52 = vmul.f32 %v2500_v49, %v2500_v49  ;;  %v2520_v10 = vsub.f32 %v3027_v34, %v2500_v49  ;;  %v2521_v0 = vsub.f32 %v3028_v35, %v2500_v49 }
 0x4c9   : > { %v2508_v54 = vpop.xlane.xlu0 %2507 }
 0x4ca   : > { %v2512_v53 = vmul.f32 0.00390625, %v2508_v54  ;;  %v2515_v42 = vmul.f32 %v2501_v51, %v2501_v51  ;;  %v2522_v11 = vsub.f32 %v3029_v38, %v2501_v51  ;;  %v2523_v15 = vsub.f32 %v3030_v41, %v2501_v51 }
 0x4cb   : > { %v2511_v55 = vpop.xlane.xlu1 %2510  ;;  %v2601_v38 = vrot.slane %v2596_v13, %v3994_v29 }
 0x4cc   : > { %v2516_v57 = vsub.f32 %v2512_v53, %v2514_v52  ;;  %v2513_v58 = vmul.f32 0.00390625, %v2511_v55 }
 0x4ce   : > { %v2518_v59 = vmax.f32 %v2516_v57, 0.0  ;;  %v2517_v60 = vsub.f32 %v2513_v58, %v2515_v42 }
 0x4d0   : > { %v2524_v44 = vadd.f32 1e-05, %v2518_v59  ;;  %v2519_v61 = vmax.f32 %v2517_v60, 0.0 }
 0x4d2   : > { %3530 = vrsqrt.f32 %v2524_v44  ;;  %v2525_v62 = vadd.f32 1e-05, %v2519_v61 }
 0x4d4   : > { %3532 = vrsqrt.f32 %v2525_v62 }
 0x4dc   : > { %v3531_v6 = vpop.eup %3530 }
 0x4dd   : > { %v2528_v18 = vmul.f32 %v3531_v6, %v2520_v10  ;;  %v2529_v19 = vmul.f32 %v3531_v6, %v2521_v0 }
 0x4de   : > { %v3533_v12 = vpop.eup %3532 }
 0x4df   : > { %v2550_v20 = vmul.f32 %v2545_v2, %v2528_v18  ;;  %v2551_v21 = vmul.f32 %v2549_v4, %v2529_v19  ;;  %v2530_v23 = vmul.f32 %v3533_v12, %v2522_v11  ;;  %v2531_v17 = vmul.f32 %v3533_v12, %v2523_v15 }
 0x4e1   : > { %v2572_v28 = vadd.f32 %v2567_v7, %v2550_v20  ;;  %v2573_v24 = vadd.f32 %v2571_v8, %v2551_v21  ;;  %v2552_v25 = vmul.f32 %v2545_v2, %v2530_v23  ;;  %v2553_v26 = vmul.f32 %v2549_v4, %v2531_v17 }
 0x4e3   : > { %v2580_v27 = vmul.f32 0.70710677, %v2572_v28  ;;  %v2581_v32 = vmul.f32 0.70710677, %v2573_v24  ;;  %v2574_v22 = vadd.f32 %v2567_v7, %v2552_v25  ;;  %v2575_v33 = vadd.f32 %v2571_v8, %v2553_v26 }
 0x4e4   : > { %v2576_v35 = vmul.f32 0.5, %v2572_v28  ;;  %v2577_v39 = vmul.f32 0.5, %v2573_v24 }
 0x4e5   : > { %3534 = verf.f32 %v2580_v27  ;;  %v2582_v14 = vmul.f32 0.70710677, %v2574_v22  ;;  %v2583_v30 = vmul.f32 0.70710677, %v2575_v33  ;;  %v2578_v46 = vmul.f32 0.5, %v2574_v22 }
 0x4e6   : > { %3536 = verf.f32 %v2581_v32  ;;  %v2579_v48 = vmul.f32 0.5, %v2575_v33 }
 0x4e7   : > { %3538 = verf.f32 %v2582_v14 }
 0x4e8   : > { %3540 = verf.f32 %v2583_v30 }
 0x4ef   : > { %v3535_v34 = vpop.eup %3534 }
 0x4f0   : > { %v3537_v56 = vpop.eup %3536  ;;  %v2588_v36 = vadd.f32 1.0, %v3535_v34 }
 0x4f1   : > { %v2589_v41 = vadd.f32 1.0, %v3537_v56  ;;  %v3539_v40 = vpop.eup %3538 }
 0x4f2   : > { %v2592_v16 = vmul.f32 %v2588_v36, %v2576_v35  ;;  %v3541_v3 = vpop.eup %3540  ;;  %v2590_v31 = vadd.f32 1.0, %v3539_v40 }
 0x4f3   : > { %v2593_v43 = vmul.f32 %v2589_v41, %v2577_v39  ;;  %v2591_v49 = vadd.f32 1.0, %v3541_v3 }
 0x4f4   : > { %v2608_v47 = vmul.f32 %v2601_v38, %v2592_v16  ;;  %v2594_v51 = vmul.f32 %v2590_v31, %v2578_v46 }
 0x4f5   : > { %v2609_v50 = vmul.f32 %v2605_v37, %v2593_v43  ;;  %v2595_v54 = vmul.f32 %v2591_v49, %v2579_v48 }
 0x4f6   : > { %v2610_v53 = vmul.f32 %v2601_v38, %v2594_v51 }
 0x4f7   : > { %v2612_v52 = vadd.f32 %v2609_v50, %v2608_v47  ;;  %v2611_v29 = vmul.f32 %v2605_v37, %v2595_v54 }
 0x4f9   : > { %2613 = vadd.xlane.f32.xlu0 %v2612_v52  ;;  %v2615_v55 = vadd.f32 %v2611_v29, %v2610_v53 }
 0x4fb   : > { %2616 = vadd.xlane.f32.xlu1 %v2615_v55 }
 0x586   : > { %v2614_v57 = vpop.xlane.xlu0 %2613 }
 0x587   : > { %v2625_v42 = vadd.f32 %v3010_v9, %v2614_v57 }
 0x588   : > { %v2617_v59 = vpop.xlane.xlu1 %2616 }
 0x589   : > { %v3011_v58 = vmul.f32 -1.442695, %v2625_v42  ;;  %v2626_v60 = vadd.f32 %v3010_v9, %v2617_v59 }
 0x58b   : > { %3542 = vpow2.f32 %v3011_v58  ;;  %v3012_v44 = vmul.f32 -1.442695, %v2626_v60 }
 0x58d   : > { %3544 = vpow2.f32 %v3012_v44 }
 0x595   : > { %v3543_v61 = vpop.eup %3542 }
 0x596   : > { %v2633_v62 = vadd.f32 1.0, %v3543_v61 }
 0x597   : > { %v3545_v63 = vpop.eup %3544 }
 0x598   : > { %3546 = vrcp.f32 %v2633_v62  ;;  %v2634_v1 = vadd.f32 1.0, %v3545_v63 }
 0x59a   : > { %3548 = vrcp.f32 %v2634_v1 }
 0x5a2   : > { %v3547_v45 = vpop.eup %3546 }
 0x5a3   : > { %2640 = vst.msk [vmem:[%s344_s13] sm:$0xff] %vm2639_vm0, %v3547_v45 }
 0x5a4   : > { %v3549_v5 = vpop.eup %3548 }
 0x5a5   : > { %2641 = vst.msk [vmem:[%s344_s13 + $0x8] sm:$0xff] %vm2639_vm0, %v3549_v5 }
 0x5a6 PF: > { %p21_p11 = scmp.ge.s32.totalorder %s3885_s11, 6   ;;  %s4164_s26 = smov %s3698_s27 }
 0x5a7   : > { %s4165_s27 = smov %s3702_s28  ;;  %s4166_s28 = smov %s3895_s10 }
 0x5a8   : > { %s4167_s29 = smov %s3885_s11  ;;  %23 = sbr.rel (!%p21_p11) target bundleno = 8 (0x8), region = 100 }
 0x5af   :  { %2664 = vsyncpa [#allocation4], 1 }
 0x5b0   :  { %2666 = vsyncpa [#allocation4 + $0x1], 1 }
 0x5b1   :  { %2667 = vsyncpa [#allocation6], 1 }
 0x5b2   :  { %2668 = vsyncpa [#allocation9], 1 }

</bundles_post_ra>
